<compile_context>
chip_gen: v7x
topology: tpu7x:2x2x1
jax: 0.10.0
libtpu: 0.0.40
codegen_flags: <defaults>
</compile_context>

<pallas_src>
import functools

import numpy as np
import jax
import jax.numpy as jnp
from jax.experimental import pallas as pl
from jax.experimental.pallas import tpu as pltpu

# ---- model hyper-parameters (small, consistent with the module's __init__) ----
D_MODEL = 32
NHEAD = 4
NUM_LAYERS = 2
DIM_FF = 64
SEQ_LEN = 8
BATCH = 2


# ---------------------------------------------------------------------------
# Pallas kernel: full 2-layer encoder, whole batch, single gridless invocation
# ---------------------------------------------------------------------------
def encoder_kernel(x_ref, wattn_ref, vec_ref, w1b1_ref, w2_ref, const_ref, out_ref, *,
                   n_batch, seq_len, d_model, nhead, num_layers):
    f32 = jnp.float32
    NL = n_batch * seq_len          # flattened activation rows (16)
    C = nhead * NL                  # expanded key/value rows, head-major blocks (64)
    D = d_model

    # const_ref layout (precomputed wrapper-side, all f32):
    #   rows [0, NL)        lanes [0, C): neg_bias  (0 valid / -1e30 cross-batch)
    #   rows [NL, 2NL)      lanes [0, C): inv_valid (0 valid / 1 cross-batch)
    #   rows [2NL, 2NL+C)   lanes [0, C): block_sum (same (head,batch) block indicator)
    #   rows [2NL+C, 3NL+C) lanes [0, D): one-hot positional encoding

    def layernorm(z, g_row, b_row, eps=1e-5):
        g = vec_ref[g_row:g_row + 1, :]
        b = vec_ref[b_row:b_row + 1, :]
        mu = jnp.mean(z, axis=-1, keepdims=True)
        var = jnp.mean((z - mu) ** 2, axis=-1, keepdims=True)
        return (z - mu) * jax.lax.rsqrt(var + eps) * g + b

    def mha(z, set_idx, bo_row):
        # single fused projection: [Q (scale folded) | K_wide (head-masked) | V'_wide (wo folded)]
        w = wattn_ref[set_idx]                                     # (D, D + 2*nhead*D)
        proj = jnp.dot(z, w, preferred_element_type=f32)           # (NL, 288)
        q = proj[:, 0:D]                                           # (NL, D)
        k_off, v_off = D, D + nhead * D
        # relayout (NL, nhead*D) lane blocks -> (nhead*NL, D) head-major sublane blocks
        k_exp = jnp.concatenate(
            [proj[:, k_off + h * D:k_off + (h + 1) * D] for h in range(nhead)], axis=0)
        v_exp = jnp.concatenate(
            [proj[:, v_off + h * D:v_off + (h + 1) * D] for h in range(nhead)], axis=0)
        # all (head, batch) energies in one NT contraction
        e = jax.lax.dot_general(q, k_exp, (((1,), (1,)), ((), ())),
                                preferred_element_type=f32)        # (NL, C)
        e = e + const_ref[0:NL, 0:C]                               # mask cross-batch columns
        p = jnp.exp(e - jnp.max(e, axis=-1, keepdims=True))
        den = jnp.dot(p, const_ref[2 * NL:2 * NL + C, 0:C],
                      preferred_element_type=f32) + const_ref[NL:2 * NL, 0:C]
        # guard: a fully-underflowed valid block contributes 0 instead of 0*inf NaN
        den = jnp.maximum(den, f32(1e-30))
        a = p * pl.reciprocal(den, approx=True)                    # block-wise softmax
        o = jnp.dot(a, v_exp, preferred_element_type=f32)          # (NL, D); wo already folded
        return o + vec_ref[bo_row:bo_row + 1, :]

    # one-hot positional encoding (precomputed) + input
    x = x_ref[...] + const_ref[2 * NL + C:3 * NL + C, 0:D]

    # both layers share ONE parameter set; short static trip count, fully unrolled
    for _ in range(num_layers):
        x = layernorm(x + mha(x, 0, 0), 1, 2)                      # self_attn  + norm1
        x = layernorm(x + mha(x, 1, 3), 4, 5)                      # multihead_attn + norm2
        h = jnp.maximum(jnp.dot(x, w1b1_ref[0:D, :], preferred_element_type=f32)
                        + w1b1_ref[D:D + 1, :], 0.0)
        x = x + jnp.dot(h, w2_ref[...], preferred_element_type=f32) + vec_ref[6:7, :]

    out_ref[...] = x.astype(out_ref.dtype)


def tran_encoder(seq, packed, *, nhead, num_layers):
    N, L, D = seq.shape
    w_attn, vecs, w1b1, w2_t, consts = packed
    NL = N * L
    kernel = functools.partial(encoder_kernel, n_batch=N, seq_len=L, d_model=D,
                               nhead=nhead, num_layers=num_layers)
    vmem = pl.BlockSpec(memory_space=pltpu.MemorySpace.VMEM)
    ins = (seq.reshape(NL, D), w_attn, vecs, w1b1, w2_t, consts)
    out = pl.pallas_call(
        kernel,
        out_shape=jax.ShapeDtypeStruct((NL, D), seq.dtype),
        in_specs=[vmem] * len(ins),
        out_specs=vmem,
    )(*ins)
    return out.reshape(N, L, D)


# ---------------------------------------------------------------------------
# deterministic parameter construction (torch nn.Linear-style uniform init)
# ---------------------------------------------------------------------------
def init_raw_params(key, d_model, nhead, dim_ff):
    hd = d_model // nhead
    ks = iter(jax.random.split(key, 16))

    def lin(fan_in, shape):
        b = 1.0 / np.sqrt(fan_in)
        return jax.random.uniform(next(ks), shape, jnp.float32, -b, b)

    wq1 = lin(hd, (hd, hd)); wk1 = lin(hd, (hd, hd)); wv1 = lin(hd, (hd, hd))
    wo1 = lin(d_model, (d_model, d_model)); bo1 = lin(d_model, (d_model,))
    g1 = jnp.ones((d_model,), jnp.float32); bt1 = jnp.zeros((d_model,), jnp.float32)
    wq2 = lin(hd, (hd, hd)); wk2 = lin(hd, (hd, hd)); wv2 = lin(hd, (hd, hd))
    wo2 = lin(d_model, (d_model, d_model)); bo2 = lin(d_model, (d_model,))
    g2 = jnp.ones((d_model,), jnp.float32); bt2 = jnp.zeros((d_model,), jnp.float32)
    w1 = lin(d_model, (dim_ff, d_model)); b1 = lin(d_model, (dim_ff,))
    w2 = lin(dim_ff, (d_model, dim_ff)); b2 = lin(dim_ff, (d_model,))
    return (wq1, wk1, wv1, wo1, bo1, g1, bt1,
            wq2, wk2, wv2, wo2, bo2, g2, bt2,
            w1, b1, w2, b2)


# ---------------------------------------------------------------------------
# wrapper-side packing: fused/wide attention weights + precomputed constant slab
# ---------------------------------------------------------------------------
def pack_params(raw, *, d_model, nhead, dim_ff, n_batch, seq_len):
    (wq1, wk1, wv1, wo1, bo1, g1, bt1,
     wq2, wk2, wv2, wo2, bo2, g2, bt2,
     w1, b1, w2, b2) = raw
    hd = d_model // nhead
    scale = 1.0 / np.sqrt(float(d_model))          # torch: energy / embed_size ** 0.5

    def q_block(wq):                               # block-diag kron(I, wq.T), scale folded in
        return jnp.kron(jnp.eye(nhead, dtype=jnp.float32), wq.T) * scale

    def k_wide(wk):                                # block h: bd(wk) masked to head-h columns
        cols = []
        for h in range(nhead):
            blk = jnp.zeros((d_model, d_model), jnp.float32)
            blk = blk.at[h * hd:(h + 1) * hd, h * hd:(h + 1) * hd].set(wk.T)
            cols.append(blk)
        return jnp.concatenate(cols, axis=1)       # (D, nhead*D)

    def v_wide(wv, wo):                            # block h: sel_h @ wv.T @ wo.T[h-rows]  (wo folded)
        cols = []
        for h in range(nhead):
            m = jnp.zeros((d_model, d_model), jnp.float32)
            m = m.at[h * hd:(h + 1) * hd, :].set(wv.T @ wo.T[h * hd:(h + 1) * hd, :])
            cols.append(m)
        return jnp.concatenate(cols, axis=1)       # (D, nhead*D)

    def attn_set(wq, wk, wv, wo):
        return jnp.concatenate([q_block(wq), k_wide(wk), v_wide(wv, wo)], axis=1)  # (D, 288)

    w_attn = jnp.stack([attn_set(wq1, wk1, wv1, wo1),
                        attn_set(wq2, wk2, wv2, wo2)], axis=0)                     # (2, D, 288)

    vecs = jnp.stack([bo1, g1, bt1, bo2, g2, bt2, b2, jnp.zeros_like(b2)], axis=0)  # (8, D)
    w1b1 = jnp.concatenate([w1.T, b1.reshape(1, dim_ff)], axis=0)                   # (D+1, FF)
    w2_t = w2.T                                                                     # (FF, D)

    # --- precomputed constant slab (masks, block-sum, positional one-hot) ---
    NL = n_batch * seq_len
    C = nhead * NL
    rr = np.arange(NL)[:, None] // seq_len
    cc = (np.arange(C)[None, :] // seq_len) % n_batch
    valid = (rr == cc).astype(np.float32)                      # same-batch key columns
    br = np.arange(C)[:, None] // seq_len
    bc = np.arange(C)[None, :] // seq_len
    bsum = (br == bc).astype(np.float32)                       # same (head,batch) block
    pos = np.zeros((NL, d_model), np.float32)
    pos[np.arange(NL), np.arange(NL) % seq_len] = 1.0          # one-hot positions

    consts = np.zeros((3 * NL + C, max(C, d_model)), np.float32)
    consts[0:NL, 0:C] = (valid - 1.0) * 1e30                   # neg_bias
    consts[NL:2 * NL, 0:C] = 1.0 - valid                       # inv_valid
    consts[2 * NL:2 * NL + C, 0:C] = bsum
    consts[2 * NL + C:3 * NL + C, 0:d_model] = pos
    return w_attn, vecs, w1b1, w2_t, jnp.asarray(consts)


# ---------------------------------------------------------------------------
# pure-JAX reference (straightforward per-head einsum formulation) for correctness
# ---------------------------------------------------------------------------
def ref_forward(seq, raw, *, d_model, nhead, num_layers):
    (wq1, wk1, wv1, wo1, bo1, g1, bt1,
     wq2, wk2, wv2, wo2, bo2, g2, bt2,
     w1, b1, w2, b2) = raw
    N, L, D = seq.shape
    hd = d_model // nhead
    pos = jax.nn.one_hot(jnp.arange(L), D, dtype=seq.dtype)
    x = seq + pos[None]

    def mha(xb, wq, wk, wv, wo, bo):
        xh = xb.reshape(N, L, nhead, hd)
        q = jnp.einsum('nlhd,ed->nlhe', xh, wq)
        k = jnp.einsum('nlhd,ed->nlhe', xh, wk)
        v = jnp.einsum('nlhd,ed->nlhe', xh, wv)
        energy = jnp.einsum('nqhd,nkhd->nhqk', q, k) / jnp.sqrt(jnp.float32(d_model))
        att = jax.nn.softmax(energy, axis=-1)
        out = jnp.einsum('nhqk,nkhd->nqhd', att, v).reshape(N, L, D)
        return out @ wo.T + bo

    def layernorm(z, g, b, eps=1e-5):
        mu = z.mean(-1, keepdims=True)
        var = ((z - mu) ** 2).mean(-1, keepdims=True)
        return (z - mu) / jnp.sqrt(var + eps) * g + b

    for _ in range(num_layers):
        x = layernorm(x + mha(x, wq1, wk1, wv1, wo1, bo1), g1, bt1)
        x = layernorm(x + mha(x, wq2, wk2, wv2, wo2, bo2), g2, bt2)
        h = jnp.maximum(jnp.einsum('nld,fd->nlf', x, w1) + b1, 0.0)
        x = x + jnp.einsum('nlf,df->nld', h, w2) + b2
    return x


if __name__ == "__main__":
    key = jax.random.PRNGKey(0)
    kp, kx = jax.random.split(key)
    raw = init_raw_params(kp, D_MODEL, NHEAD, DIM_FF)
    packed = pack_params(raw, d_model=D_MODEL, nhead=NHEAD, dim_ff=DIM_FF,
                         n_batch=BATCH, seq_len=SEQ_LEN)
    seq = jax.random.normal(kx, (BATCH, SEQ_LEN, D_MODEL), dtype=jnp.float32)

    out = tran_encoder(seq, packed, nhead=NHEAD, num_layers=NUM_LAYERS)
    out = jax.block_until_ready(out)

    ref = ref_forward(seq, raw, d_model=D_MODEL, nhead=NHEAD, num_layers=NUM_LAYERS)
    assert out.shape == (BATCH, SEQ_LEN, D_MODEL)
    # tolerance 2e-3 absorbs pl.reciprocal(approx=True)'s ~2^-12 relative error
    np.testing.assert_allclose(np.asarray(out), np.asarray(ref), rtol=2e-3, atol=2e-3)

    print("KERNEL_OK")
</pallas_src>

<mosaic_0001>
module attributes {stable_mosaic.version = 11 : i64} {
  func.func @encoder_kernel(%arg0: memref<16x32xf32, #tpu.memory_space<vmem>>, %arg1: memref<2x32x288xf32, #tpu.memory_space<vmem>>, %arg2: memref<8x32xf32, #tpu.memory_space<vmem>>, %arg3: memref<33x64xf32, #tpu.memory_space<vmem>>, %arg4: memref<64x32xf32, #tpu.memory_space<vmem>>, %arg5: memref<112x64xf32, #tpu.memory_space<vmem>>, %arg6: memref<16x32xf32, #tpu.memory_space<vmem>>) attributes {dimension_semantics = [], scalar_prefetch = 0 : i64, scratch_operands = 0 : i64, tpu.core_type = #tpu.core_type<tc>} {
    %c0 = arith.constant 0 : index
    %c0_0 = arith.constant 0 : index
    %0 = vector.load %arg0[%c0, %c0_0] : memref<16x32xf32, #tpu.memory_space<vmem>>, vector<16x32xf32>
    %c96 = arith.constant 96 : index
    %c0_1 = arith.constant 0 : index
    %1 = vector.load %arg5[%c96, %c0_1] : memref<112x64xf32, #tpu.memory_space<vmem>>, vector<16x32xf32>
    %2 = arith.addf %0, %1 : vector<16x32xf32>
    %c0_2 = arith.constant 0 : index
    %c0_3 = arith.constant 0 : index
    %c0_4 = arith.constant 0 : index
    %3 = vector.load %arg1[%c0_2, %c0_3, %c0_4] : memref<2x32x288xf32, #tpu.memory_space<vmem>>, vector<1x32x288xf32>
    %4 = vector.shape_cast %3 : vector<1x32x288xf32> to vector<32x288xf32>
    %cst = arith.constant dense<0.000000e+00> : vector<16x288xf32>
    %5 = tpu.matmul %2, %4, %cst {dimension_numbers = #tpu.dot_dimension_numbers<[1], [0], [0], [1], [0, 0, 1, 1], [], []>} : vector<16x32xf32>, vector<32x288xf32>, vector<16x288xf32> -> vector<16x288xf32>
    %6 = vector.extract_strided_slice %5 {offsets = [0, 0], sizes = [16, 32], strides = [1, 1]} : vector<16x288xf32> to vector<16x32xf32>
    %7 = vector.extract_strided_slice %5 {offsets = [0, 32], sizes = [16, 32], strides = [1, 1]} : vector<16x288xf32> to vector<16x32xf32>
    %8 = vector.extract_strided_slice %5 {offsets = [0, 64], sizes = [16, 32], strides = [1, 1]} : vector<16x288xf32> to vector<16x32xf32>
    %9 = vector.extract_strided_slice %5 {offsets = [0, 96], sizes = [16, 32], strides = [1, 1]} : vector<16x288xf32> to vector<16x32xf32>
    %10 = vector.extract_strided_slice %5 {offsets = [0, 128], sizes = [16, 32], strides = [1, 1]} : vector<16x288xf32> to vector<16x32xf32>
    %11 = tpu.concatenate %7, %8, %9, %10 in 0 : vector<16x32xf32>, vector<16x32xf32>, vector<16x32xf32>, vector<16x32xf32> -> vector<64x32xf32>
    %12 = vector.extract_strided_slice %5 {offsets = [0, 160], sizes = [16, 32], strides = [1, 1]} : vector<16x288xf32> to vector<16x32xf32>
    %13 = vector.extract_strided_slice %5 {offsets = [0, 192], sizes = [16, 32], strides = [1, 1]} : vector<16x288xf32> to vector<16x32xf32>
    %14 = vector.extract_strided_slice %5 {offsets = [0, 224], sizes = [16, 32], strides = [1, 1]} : vector<16x288xf32> to vector<16x32xf32>
    %15 = vector.extract_strided_slice %5 {offsets = [0, 256], sizes = [16, 32], strides = [1, 1]} : vector<16x288xf32> to vector<16x32xf32>
    %16 = tpu.concatenate %12, %13, %14, %15 in 0 : vector<16x32xf32>, vector<16x32xf32>, vector<16x32xf32>, vector<16x32xf32> -> vector<64x32xf32>
    %cst_5 = arith.constant dense<0.000000e+00> : vector<16x64xf32>
    %17 = tpu.matmul %6, %11, %cst_5 {dimension_numbers = #tpu.dot_dimension_numbers<[1], [1], [0], [0], [0, 0, 1, 0], [], []>} : vector<16x32xf32>, vector<64x32xf32>, vector<16x64xf32> -> vector<16x64xf32>
    %c0_6 = arith.constant 0 : index
    %c0_7 = arith.constant 0 : index
    %18 = vector.load %arg5[%c0_6, %c0_7] : memref<112x64xf32, #tpu.memory_space<vmem>>, vector<16x64xf32>
    %19 = arith.addf %17, %18 : vector<16x64xf32>
    %cst_8 = arith.constant dense<0xFF800000> : vector<16xf32>
    %20 = vector.multi_reduction <maximumf>, %19, %cst_8 [1] : vector<16x64xf32> to vector<16xf32>
    %21 = vector.shape_cast %20 : vector<16xf32> to vector<16x1xf32>
    %22 = vector.broadcast %21 : vector<16x1xf32> to vector<16x64xf32>
    %23 = arith.subf %19, %22 : vector<16x64xf32>
    %24 = math.exp %23 : vector<16x64xf32>
    %c32 = arith.constant 32 : index
    %c0_9 = arith.constant 0 : index
    %25 = vector.load %arg5[%c32, %c0_9] : memref<112x64xf32, #tpu.memory_space<vmem>>, vector<64x64xf32>
    %cst_10 = arith.constant dense<0.000000e+00> : vector<16x64xf32>
    %26 = tpu.matmul %24, %25, %cst_10 {dimension_numbers = #tpu.dot_dimension_numbers<[1], [0], [0], [1], [0, 0, 1, 1], [], []>} : vector<16x64xf32>, vector<64x64xf32>, vector<16x64xf32> -> vector<16x64xf32>
    %c16 = arith.constant 16 : index
    %c0_11 = arith.constant 0 : index
    %27 = vector.load %arg5[%c16, %c0_11] : memref<112x64xf32, #tpu.memory_space<vmem>>, vector<16x64xf32>
    %28 = arith.addf %26, %27 : vector<16x64xf32>
    %cst_12 = arith.constant 1.000000e-30 : f32
    %29 = vector.broadcast %cst_12 : f32 to vector<16x64xf32>
    %30 = arith.maximumf %28, %29 : vector<16x64xf32>
    %31 = tpu.reciprocal %30 {approx = true} : vector<16x64xf32> -> vector<16x64xf32>
    %32 = arith.mulf %24, %31 : vector<16x64xf32>
    %cst_13 = arith.constant dense<0.000000e+00> : vector<16x32xf32>
    %33 = tpu.matmul %32, %16, %cst_13 {dimension_numbers = #tpu.dot_dimension_numbers<[1], [0], [0], [1], [0, 0, 1, 1], [], []>} : vector<16x64xf32>, vector<64x32xf32>, vector<16x32xf32> -> vector<16x32xf32>
    %c0_14 = arith.constant 0 : index
    %c0_15 = arith.constant 0 : index
    %34 = vector.load %arg2[%c0_14, %c0_15] : memref<8x32xf32, #tpu.memory_space<vmem>>, vector<1x32xf32>
    %35 = vector.broadcast %34 : vector<1x32xf32> to vector<16x32xf32>
    %36 = arith.addf %33, %35 : vector<16x32xf32>
    %37 = arith.addf %2, %36 : vector<16x32xf32>
    %c1 = arith.constant 1 : index
    %c0_16 = arith.constant 0 : index
    %38 = vector.load %arg2[%c1, %c0_16] : memref<8x32xf32, #tpu.memory_space<vmem>>, vector<1x32xf32>
    %c2 = arith.constant 2 : index
    %c0_17 = arith.constant 0 : index
    %39 = vector.load %arg2[%c2, %c0_17] : memref<8x32xf32, #tpu.memory_space<vmem>>, vector<1x32xf32>
    %cst_18 = arith.constant dense<0.000000e+00> : vector<16xf32>
    %40 = vector.multi_reduction <add>, %37, %cst_18 [1] : vector<16x32xf32> to vector<16xf32>
    %41 = vector.shape_cast %40 : vector<16xf32> to vector<16x1xf32>
    %cst_19 = arith.constant 3.200000e+01 : f32
    %42 = vector.broadcast %cst_19 : f32 to vector<16x1xf32>
    %43 = arith.divf %41, %42 : vector<16x1xf32>
    %44 = vector.broadcast %43 : vector<16x1xf32> to vector<16x32xf32>
    %45 = arith.subf %37, %44 : vector<16x32xf32>
    %46 = arith.mulf %45, %45 : vector<16x32xf32>
    %cst_20 = arith.constant dense<0.000000e+00> : vector<16xf32>
    %47 = vector.multi_reduction <add>, %46, %cst_20 [1] : vector<16x32xf32> to vector<16xf32>
    %48 = vector.shape_cast %47 : vector<16xf32> to vector<16x1xf32>
    %cst_21 = arith.constant 3.200000e+01 : f32
    %49 = vector.broadcast %cst_21 : f32 to vector<16x1xf32>
    %50 = arith.divf %48, %49 : vector<16x1xf32>
    %51 = vector.broadcast %43 : vector<16x1xf32> to vector<16x32xf32>
    %52 = arith.subf %37, %51 : vector<16x32xf32>
    %cst_22 = arith.constant 9.99999974E-6 : f32
    %53 = vector.broadcast %cst_22 : f32 to vector<16x1xf32>
    %54 = arith.addf %50, %53 : vector<16x1xf32>
    %55 = math.rsqrt %54 : vector<16x1xf32>
    %56 = vector.broadcast %55 : vector<16x1xf32> to vector<16x32xf32>
    %57 = arith.mulf %52, %56 : vector<16x32xf32>
    %58 = vector.broadcast %38 : vector<1x32xf32> to vector<16x32xf32>
    %59 = arith.mulf %57, %58 : vector<16x32xf32>
    %60 = vector.broadcast %39 : vector<1x32xf32> to vector<16x32xf32>
    %61 = arith.addf %59, %60 : vector<16x32xf32>
    %c1_23 = arith.constant 1 : index
    %c0_24 = arith.constant 0 : index
    %c0_25 = arith.constant 0 : index
    %62 = vector.load %arg1[%c1_23, %c0_24, %c0_25] : memref<2x32x288xf32, #tpu.memory_space<vmem>>, vector<1x32x288xf32>
    %63 = vector.shape_cast %62 : vector<1x32x288xf32> to vector<32x288xf32>
    %cst_26 = arith.constant dense<0.000000e+00> : vector<16x288xf32>
    %64 = tpu.matmul %61, %63, %cst_26 {dimension_numbers = #tpu.dot_dimension_numbers<[1], [0], [0], [1], [0, 0, 1, 1], [], []>} : vector<16x32xf32>, vector<32x288xf32>, vector<16x288xf32> -> vector<16x288xf32>
    %65 = vector.extract_strided_slice %64 {offsets = [0, 0], sizes = [16, 32], strides = [1, 1]} : vector<16x288xf32> to vector<16x32xf32>
    %66 = vector.extract_strided_slice %64 {offsets = [0, 32], sizes = [16, 32], strides = [1, 1]} : vector<16x288xf32> to vector<16x32xf32>
    %67 = vector.extract_strided_slice %64 {offsets = [0, 64], sizes = [16, 32], strides = [1, 1]} : vector<16x288xf32> to vector<16x32xf32>
    %68 = vector.extract_strided_slice %64 {offsets = [0, 96], sizes = [16, 32], strides = [1, 1]} : vector<16x288xf32> to vector<16x32xf32>
    %69 = vector.extract_strided_slice %64 {offsets = [0, 128], sizes = [16, 32], strides = [1, 1]} : vector<16x288xf32> to vector<16x32xf32>
    %70 = tpu.concatenate %66, %67, %68, %69 in 0 : vector<16x32xf32>, vector<16x32xf32>, vector<16x32xf32>, vector<16x32xf32> -> vector<64x32xf32>
    %71 = vector.extract_strided_slice %64 {offsets = [0, 160], sizes = [16, 32], strides = [1, 1]} : vector<16x288xf32> to vector<16x32xf32>
    %72 = vector.extract_strided_slice %64 {offsets = [0, 192], sizes = [16, 32], strides = [1, 1]} : vector<16x288xf32> to vector<16x32xf32>
    %73 = vector.extract_strided_slice %64 {offsets = [0, 224], sizes = [16, 32], strides = [1, 1]} : vector<16x288xf32> to vector<16x32xf32>
    %74 = vector.extract_strided_slice %64 {offsets = [0, 256], sizes = [16, 32], strides = [1, 1]} : vector<16x288xf32> to vector<16x32xf32>
    %75 = tpu.concatenate %71, %72, %73, %74 in 0 : vector<16x32xf32>, vector<16x32xf32>, vector<16x32xf32>, vector<16x32xf32> -> vector<64x32xf32>
    %cst_27 = arith.constant dense<0.000000e+00> : vector<16x64xf32>
    %76 = tpu.matmul %65, %70, %cst_27 {dimension_numbers = #tpu.dot_dimension_numbers<[1], [1], [0], [0], [0, 0, 1, 0], [], []>} : vector<16x32xf32>, vector<64x32xf32>, vector<16x64xf32> -> vector<16x64xf32>
    %c0_28 = arith.constant 0 : index
    %c0_29 = arith.constant 0 : index
    %77 = vector.load %arg5[%c0_28, %c0_29] : memref<112x64xf32, #tpu.memory_space<vmem>>, vector<16x64xf32>
    %78 = arith.addf %76, %77 : vector<16x64xf32>
    %cst_30 = arith.constant dense<0xFF800000> : vector<16xf32>
    %79 = vector.multi_reduction <maximumf>, %78, %cst_30 [1] : vector<16x64xf32> to vector<16xf32>
    %80 = vector.shape_cast %79 : vector<16xf32> to vector<16x1xf32>
    %81 = vector.broadcast %80 : vector<16x1xf32> to vector<16x64xf32>
    %82 = arith.subf %78, %81 : vector<16x64xf32>
    %83 = math.exp %82 : vector<16x64xf32>
    %c32_31 = arith.constant 32 : index
    %c0_32 = arith.constant 0 : index
    %84 = vector.load %arg5[%c32_31, %c0_32] : memref<112x64xf32, #tpu.memory_space<vmem>>, vector<64x64xf32>
    %cst_33 = arith.constant dense<0.000000e+00> : vector<16x64xf32>
    %85 = tpu.matmul %83, %84, %cst_33 {dimension_numbers = #tpu.dot_dimension_numbers<[1], [0], [0], [1], [0, 0, 1, 1], [], []>} : vector<16x64xf32>, vector<64x64xf32>, vector<16x64xf32> -> vector<16x64xf32>
    %c16_34 = arith.constant 16 : index
    %c0_35 = arith.constant 0 : index
    %86 = vector.load %arg5[%c16_34, %c0_35] : memref<112x64xf32, #tpu.memory_space<vmem>>, vector<16x64xf32>
    %87 = arith.addf %85, %86 : vector<16x64xf32>
    %cst_36 = arith.constant 1.000000e-30 : f32
    %88 = vector.broadcast %cst_36 : f32 to vector<16x64xf32>
    %89 = arith.maximumf %87, %88 : vector<16x64xf32>
    %90 = tpu.reciprocal %89 {approx = true} : vector<16x64xf32> -> vector<16x64xf32>
    %91 = arith.mulf %83, %90 : vector<16x64xf32>
    %cst_37 = arith.constant dense<0.000000e+00> : vector<16x32xf32>
    %92 = tpu.matmul %91, %75, %cst_37 {dimension_numbers = #tpu.dot_dimension_numbers<[1], [0], [0], [1], [0, 0, 1, 1], [], []>} : vector<16x64xf32>, vector<64x32xf32>, vector<16x32xf32> -> vector<16x32xf32>
    %c3 = arith.constant 3 : index
    %c0_38 = arith.constant 0 : index
    %93 = vector.load %arg2[%c3, %c0_38] : memref<8x32xf32, #tpu.memory_space<vmem>>, vector<1x32xf32>
    %94 = vector.broadcast %93 : vector<1x32xf32> to vector<16x32xf32>
    %95 = arith.addf %92, %94 : vector<16x32xf32>
    %96 = arith.addf %61, %95 : vector<16x32xf32>
    %c4 = arith.constant 4 : index
    %c0_39 = arith.constant 0 : index
    %97 = vector.load %arg2[%c4, %c0_39] : memref<8x32xf32, #tpu.memory_space<vmem>>, vector<1x32xf32>
    %c5 = arith.constant 5 : index
    %c0_40 = arith.constant 0 : index
    %98 = vector.load %arg2[%c5, %c0_40] : memref<8x32xf32, #tpu.memory_space<vmem>>, vector<1x32xf32>
    %cst_41 = arith.constant dense<0.000000e+00> : vector<16xf32>
    %99 = vector.multi_reduction <add>, %96, %cst_41 [1] : vector<16x32xf32> to vector<16xf32>
    %100 = vector.shape_cast %99 : vector<16xf32> to vector<16x1xf32>
    %cst_42 = arith.constant 3.200000e+01 : f32
    %101 = vector.broadcast %cst_42 : f32 to vector<16x1xf32>
    %102 = arith.divf %100, %101 : vector<16x1xf32>
    %103 = vector.broadcast %102 : vector<16x1xf32> to vector<16x32xf32>
    %104 = arith.subf %96, %103 : vector<16x32xf32>
    %105 = arith.mulf %104, %104 : vector<16x32xf32>
    %cst_43 = arith.constant dense<0.000000e+00> : vector<16xf32>
    %106 = vector.multi_reduction <add>, %105, %cst_43 [1] : vector<16x32xf32> to vector<16xf32>
    %107 = vector.shape_cast %106 : vector<16xf32> to vector<16x1xf32>
    %cst_44 = arith.constant 3.200000e+01 : f32
    %108 = vector.broadcast %cst_44 : f32 to vector<16x1xf32>
    %109 = arith.divf %107, %108 : vector<16x1xf32>
    %110 = vector.broadcast %102 : vector<16x1xf32> to vector<16x32xf32>
    %111 = arith.subf %96, %110 : vector<16x32xf32>
    %cst_45 = arith.constant 9.99999974E-6 : f32
    %112 = vector.broadcast %cst_45 : f32 to vector<16x1xf32>
    %113 = arith.addf %109, %112 : vector<16x1xf32>
    %114 = math.rsqrt %113 : vector<16x1xf32>
    %115 = vector.broadcast %114 : vector<16x1xf32> to vector<16x32xf32>
    %116 = arith.mulf %111, %115 : vector<16x32xf32>
    %117 = vector.broadcast %97 : vector<1x32xf32> to vector<16x32xf32>
    %118 = arith.mulf %116, %117 : vector<16x32xf32>
    %119 = vector.broadcast %98 : vector<1x32xf32> to vector<16x32xf32>
    %120 = arith.addf %118, %119 : vector<16x32xf32>
    %c0_46 = arith.constant 0 : index
    %c0_47 = arith.constant 0 : index
    %121 = vector.load %arg3[%c0_46, %c0_47] : memref<33x64xf32, #tpu.memory_space<vmem>>, vector<32x64xf32>
    %cst_48 = arith.constant dense<0.000000e+00> : vector<16x64xf32>
    %122 = tpu.matmul %120, %121, %cst_48 {dimension_numbers = #tpu.dot_dimension_numbers<[1], [0], [0], [1], [0, 0, 1, 1], [], []>} : vector<16x32xf32>, vector<32x64xf32>, vector<16x64xf32> -> vector<16x64xf32>
    %c32_49 = arith.constant 32 : index
    %c0_50 = arith.constant 0 : index
    %123 = vector.load %arg3[%c32_49, %c0_50] : memref<33x64xf32, #tpu.memory_space<vmem>>, vector<1x64xf32>
    %124 = vector.broadcast %123 : vector<1x64xf32> to vector<16x64xf32>
    %125 = arith.addf %122, %124 : vector<16x64xf32>
    %cst_51 = arith.constant 0.000000e+00 : f32
    %126 = vector.broadcast %cst_51 : f32 to vector<16x64xf32>
    %127 = arith.maximumf %125, %126 : vector<16x64xf32>
    %c0_52 = arith.constant 0 : index
    %c0_53 = arith.constant 0 : index
    %128 = vector.load %arg4[%c0_52, %c0_53] : memref<64x32xf32, #tpu.memory_space<vmem>>, vector<64x32xf32>
    %cst_54 = arith.constant dense<0.000000e+00> : vector<16x32xf32>
    %129 = tpu.matmul %127, %128, %cst_54 {dimension_numbers = #tpu.dot_dimension_numbers<[1], [0], [0], [1], [0, 0, 1, 1], [], []>} : vector<16x64xf32>, vector<64x32xf32>, vector<16x32xf32> -> vector<16x32xf32>
    %130 = arith.addf %120, %129 : vector<16x32xf32>
    %c6 = arith.constant 6 : index
    %c0_55 = arith.constant 0 : index
    %131 = vector.load %arg2[%c6, %c0_55] : memref<8x32xf32, #tpu.memory_space<vmem>>, vector<1x32xf32>
    %132 = vector.broadcast %131 : vector<1x32xf32> to vector<16x32xf32>
    %133 = arith.addf %130, %132 : vector<16x32xf32>
    %c0_56 = arith.constant 0 : index
    %c0_57 = arith.constant 0 : index
    %c0_58 = arith.constant 0 : index
    %134 = vector.load %arg1[%c0_56, %c0_57, %c0_58] : memref<2x32x288xf32, #tpu.memory_space<vmem>>, vector<1x32x288xf32>
    %135 = vector.shape_cast %134 : vector<1x32x288xf32> to vector<32x288xf32>
    %cst_59 = arith.constant dense<0.000000e+00> : vector<16x288xf32>
    %136 = tpu.matmul %133, %135, %cst_59 {dimension_numbers = #tpu.dot_dimension_numbers<[1], [0], [0], [1], [0, 0, 1, 1], [], []>} : vector<16x32xf32>, vector<32x288xf32>, vector<16x288xf32> -> vector<16x288xf32>
    %137 = vector.extract_strided_slice %136 {offsets = [0, 0], sizes = [16, 32], strides = [1, 1]} : vector<16x288xf32> to vector<16x32xf32>
    %138 = vector.extract_strided_slice %136 {offsets = [0, 32], sizes = [16, 32], strides = [1, 1]} : vector<16x288xf32> to vector<16x32xf32>
    %139 = vector.extract_strided_slice %136 {offsets = [0, 64], sizes = [16, 32], strides = [1, 1]} : vector<16x288xf32> to vector<16x32xf32>
    %140 = vector.extract_strided_slice %136 {offsets = [0, 96], sizes = [16, 32], strides = [1, 1]} : vector<16x288xf32> to vector<16x32xf32>
    %141 = vector.extract_strided_slice %136 {offsets = [0, 128], sizes = [16, 32], strides = [1, 1]} : vector<16x288xf32> to vector<16x32xf32>
    %142 = tpu.concatenate %138, %139, %140, %141 in 0 : vector<16x32xf32>, vector<16x32xf32>, vector<16x32xf32>, vector<16x32xf32> -> vector<64x32xf32>
    %143 = vector.extract_strided_slice %136 {offsets = [0, 160], sizes = [16, 32], strides = [1, 1]} : vector<16x288xf32> to vector<16x32xf32>
    %144 = vector.extract_strided_slice %136 {offsets = [0, 192], sizes = [16, 32], strides = [1, 1]} : vector<16x288xf32> to vector<16x32xf32>
    %145 = vector.extract_strided_slice %136 {offsets = [0, 224], sizes = [16, 32], strides = [1, 1]} : vector<16x288xf32> to vector<16x32xf32>
    %146 = vector.extract_strided_slice %136 {offsets = [0, 256], sizes = [16, 32], strides = [1, 1]} : vector<16x288xf32> to vector<16x32xf32>
    %147 = tpu.concatenate %143, %144, %145, %146 in 0 : vector<16x32xf32>, vector<16x32xf32>, vector<16x32xf32>, vector<16x32xf32> -> vector<64x32xf32>
    %cst_60 = arith.constant dense<0.000000e+00> : vector<16x64xf32>
    %148 = tpu.matmul %137, %142, %cst_60 {dimension_numbers = #tpu.dot_dimension_numbers<[1], [1], [0], [0], [0, 0, 1, 0], [], []>} : vector<16x32xf32>, vector<64x32xf32>, vector<16x64xf32> -> vector<16x64xf32>
    %c0_61 = arith.constant 0 : index
    %c0_62 = arith.constant 0 : index
    %149 = vector.load %arg5[%c0_61, %c0_62] : memref<112x64xf32, #tpu.memory_space<vmem>>, vector<16x64xf32>
    %150 = arith.addf %148, %149 : vector<16x64xf32>
    %cst_63 = arith.constant dense<0xFF800000> : vector<16xf32>
    %151 = vector.multi_reduction <maximumf>, %150, %cst_63 [1] : vector<16x64xf32> to vector<16xf32>
    %152 = vector.shape_cast %151 : vector<16xf32> to vector<16x1xf32>
    %153 = vector.broadcast %152 : vector<16x1xf32> to vector<16x64xf32>
    %154 = arith.subf %150, %153 : vector<16x64xf32>
    %155 = math.exp %154 : vector<16x64xf32>
    %c32_64 = arith.constant 32 : index
    %c0_65 = arith.constant 0 : index
    %156 = vector.load %arg5[%c32_64, %c0_65] : memref<112x64xf32, #tpu.memory_space<vmem>>, vector<64x64xf32>
    %cst_66 = arith.constant dense<0.000000e+00> : vector<16x64xf32>
    %157 = tpu.matmul %155, %156, %cst_66 {dimension_numbers = #tpu.dot_dimension_numbers<[1], [0], [0], [1], [0, 0, 1, 1], [], []>} : vector<16x64xf32>, vector<64x64xf32>, vector<16x64xf32> -> vector<16x64xf32>
    %c16_67 = arith.constant 16 : index
    %c0_68 = arith.constant 0 : index
    %158 = vector.load %arg5[%c16_67, %c0_68] : memref<112x64xf32, #tpu.memory_space<vmem>>, vector<16x64xf32>
    %159 = arith.addf %157, %158 : vector<16x64xf32>
    %cst_69 = arith.constant 1.000000e-30 : f32
    %160 = vector.broadcast %cst_69 : f32 to vector<16x64xf32>
    %161 = arith.maximumf %159, %160 : vector<16x64xf32>
    %162 = tpu.reciprocal %161 {approx = true} : vector<16x64xf32> -> vector<16x64xf32>
    %163 = arith.mulf %155, %162 : vector<16x64xf32>
    %cst_70 = arith.constant dense<0.000000e+00> : vector<16x32xf32>
    %164 = tpu.matmul %163, %147, %cst_70 {dimension_numbers = #tpu.dot_dimension_numbers<[1], [0], [0], [1], [0, 0, 1, 1], [], []>} : vector<16x64xf32>, vector<64x32xf32>, vector<16x32xf32> -> vector<16x32xf32>
    %c0_71 = arith.constant 0 : index
    %c0_72 = arith.constant 0 : index
    %165 = vector.load %arg2[%c0_71, %c0_72] : memref<8x32xf32, #tpu.memory_space<vmem>>, vector<1x32xf32>
    %166 = vector.broadcast %165 : vector<1x32xf32> to vector<16x32xf32>
    %167 = arith.addf %164, %166 : vector<16x32xf32>
    %168 = arith.addf %133, %167 : vector<16x32xf32>
    %c1_73 = arith.constant 1 : index
    %c0_74 = arith.constant 0 : index
    %169 = vector.load %arg2[%c1_73, %c0_74] : memref<8x32xf32, #tpu.memory_space<vmem>>, vector<1x32xf32>
    %c2_75 = arith.constant 2 : index
    %c0_76 = arith.constant 0 : index
    %170 = vector.load %arg2[%c2_75, %c0_76] : memref<8x32xf32, #tpu.memory_space<vmem>>, vector<1x32xf32>
    %cst_77 = arith.constant dense<0.000000e+00> : vector<16xf32>
    %171 = vector.multi_reduction <add>, %168, %cst_77 [1] : vector<16x32xf32> to vector<16xf32>
    %172 = vector.shape_cast %171 : vector<16xf32> to vector<16x1xf32>
    %cst_78 = arith.constant 3.200000e+01 : f32
    %173 = vector.broadcast %cst_78 : f32 to vector<16x1xf32>
    %174 = arith.divf %172, %173 : vector<16x1xf32>
    %175 = vector.broadcast %174 : vector<16x1xf32> to vector<16x32xf32>
    %176 = arith.subf %168, %175 : vector<16x32xf32>
    %177 = arith.mulf %176, %176 : vector<16x32xf32>
    %cst_79 = arith.constant dense<0.000000e+00> : vector<16xf32>
    %178 = vector.multi_reduction <add>, %177, %cst_79 [1] : vector<16x32xf32> to vector<16xf32>
    %179 = vector.shape_cast %178 : vector<16xf32> to vector<16x1xf32>
    %cst_80 = arith.constant 3.200000e+01 : f32
    %180 = vector.broadcast %cst_80 : f32 to vector<16x1xf32>
    %181 = arith.divf %179, %180 : vector<16x1xf32>
    %182 = vector.broadcast %174 : vector<16x1xf32> to vector<16x32xf32>
    %183 = arith.subf %168, %182 : vector<16x32xf32>
    %cst_81 = arith.constant 9.99999974E-6 : f32
    %184 = vector.broadcast %cst_81 : f32 to vector<16x1xf32>
    %185 = arith.addf %181, %184 : vector<16x1xf32>
    %186 = math.rsqrt %185 : vector<16x1xf32>
    %187 = vector.broadcast %186 : vector<16x1xf32> to vector<16x32xf32>
    %188 = arith.mulf %183, %187 : vector<16x32xf32>
    %189 = vector.broadcast %169 : vector<1x32xf32> to vector<16x32xf32>
    %190 = arith.mulf %188, %189 : vector<16x32xf32>
    %191 = vector.broadcast %170 : vector<1x32xf32> to vector<16x32xf32>
    %192 = arith.addf %190, %191 : vector<16x32xf32>
    %c1_82 = arith.constant 1 : index
    %c0_83 = arith.constant 0 : index
    %c0_84 = arith.constant 0 : index
    %193 = vector.load %arg1[%c1_82, %c0_83, %c0_84] : memref<2x32x288xf32, #tpu.memory_space<vmem>>, vector<1x32x288xf32>
    %194 = vector.shape_cast %193 : vector<1x32x288xf32> to vector<32x288xf32>
    %cst_85 = arith.constant dense<0.000000e+00> : vector<16x288xf32>
    %195 = tpu.matmul %192, %194, %cst_85 {dimension_numbers = #tpu.dot_dimension_numbers<[1], [0], [0], [1], [0, 0, 1, 1], [], []>} : vector<16x32xf32>, vector<32x288xf32>, vector<16x288xf32> -> vector<16x288xf32>
    %196 = vector.extract_strided_slice %195 {offsets = [0, 0], sizes = [16, 32], strides = [1, 1]} : vector<16x288xf32> to vector<16x32xf32>
    %197 = vector.extract_strided_slice %195 {offsets = [0, 32], sizes = [16, 32], strides = [1, 1]} : vector<16x288xf32> to vector<16x32xf32>
    %198 = vector.extract_strided_slice %195 {offsets = [0, 64], sizes = [16, 32], strides = [1, 1]} : vector<16x288xf32> to vector<16x32xf32>
    %199 = vector.extract_strided_slice %195 {offsets = [0, 96], sizes = [16, 32], strides = [1, 1]} : vector<16x288xf32> to vector<16x32xf32>
    %200 = vector.extract_strided_slice %195 {offsets = [0, 128], sizes = [16, 32], strides = [1, 1]} : vector<16x288xf32> to vector<16x32xf32>
    %201 = tpu.concatenate %197, %198, %199, %200 in 0 : vector<16x32xf32>, vector<16x32xf32>, vector<16x32xf32>, vector<16x32xf32> -> vector<64x32xf32>
    %202 = vector.extract_strided_slice %195 {offsets = [0, 160], sizes = [16, 32], strides = [1, 1]} : vector<16x288xf32> to vector<16x32xf32>
    %203 = vector.extract_strided_slice %195 {offsets = [0, 192], sizes = [16, 32], strides = [1, 1]} : vector<16x288xf32> to vector<16x32xf32>
    %204 = vector.extract_strided_slice %195 {offsets = [0, 224], sizes = [16, 32], strides = [1, 1]} : vector<16x288xf32> to vector<16x32xf32>
    %205 = vector.extract_strided_slice %195 {offsets = [0, 256], sizes = [16, 32], strides = [1, 1]} : vector<16x288xf32> to vector<16x32xf32>
    %206 = tpu.concatenate %202, %203, %204, %205 in 0 : vector<16x32xf32>, vector<16x32xf32>, vector<16x32xf32>, vector<16x32xf32> -> vector<64x32xf32>
    %cst_86 = arith.constant dense<0.000000e+00> : vector<16x64xf32>
    %207 = tpu.matmul %196, %201, %cst_86 {dimension_numbers = #tpu.dot_dimension_numbers<[1], [1], [0], [0], [0, 0, 1, 0], [], []>} : vector<16x32xf32>, vector<64x32xf32>, vector<16x64xf32> -> vector<16x64xf32>
    %c0_87 = arith.constant 0 : index
    %c0_88 = arith.constant 0 : index
    %208 = vector.load %arg5[%c0_87, %c0_88] : memref<112x64xf32, #tpu.memory_space<vmem>>, vector<16x64xf32>
    %209 = arith.addf %207, %208 : vector<16x64xf32>
    %cst_89 = arith.constant dense<0xFF800000> : vector<16xf32>
    %210 = vector.multi_reduction <maximumf>, %209, %cst_89 [1] : vector<16x64xf32> to vector<16xf32>
    %211 = vector.shape_cast %210 : vector<16xf32> to vector<16x1xf32>
    %212 = vector.broadcast %211 : vector<16x1xf32> to vector<16x64xf32>
    %213 = arith.subf %209, %212 : vector<16x64xf32>
    %214 = math.exp %213 : vector<16x64xf32>
    %c32_90 = arith.constant 32 : index
    %c0_91 = arith.constant 0 : index
    %215 = vector.load %arg5[%c32_90, %c0_91] : memref<112x64xf32, #tpu.memory_space<vmem>>, vector<64x64xf32>
    %cst_92 = arith.constant dense<0.000000e+00> : vector<16x64xf32>
    %216 = tpu.matmul %214, %215, %cst_92 {dimension_numbers = #tpu.dot_dimension_numbers<[1], [0], [0], [1], [0, 0, 1, 1], [], []>} : vector<16x64xf32>, vector<64x64xf32>, vector<16x64xf32> -> vector<16x64xf32>
    %c16_93 = arith.constant 16 : index
    %c0_94 = arith.constant 0 : index
    %217 = vector.load %arg5[%c16_93, %c0_94] : memref<112x64xf32, #tpu.memory_space<vmem>>, vector<16x64xf32>
    %218 = arith.addf %216, %217 : vector<16x64xf32>
    %cst_95 = arith.constant 1.000000e-30 : f32
    %219 = vector.broadcast %cst_95 : f32 to vector<16x64xf32>
    %220 = arith.maximumf %218, %219 : vector<16x64xf32>
    %221 = tpu.reciprocal %220 {approx = true} : vector<16x64xf32> -> vector<16x64xf32>
    %222 = arith.mulf %214, %221 : vector<16x64xf32>
    %cst_96 = arith.constant dense<0.000000e+00> : vector<16x32xf32>
    %223 = tpu.matmul %222, %206, %cst_96 {dimension_numbers = #tpu.dot_dimension_numbers<[1], [0], [0], [1], [0, 0, 1, 1], [], []>} : vector<16x64xf32>, vector<64x32xf32>, vector<16x32xf32> -> vector<16x32xf32>
    %c3_97 = arith.constant 3 : index
    %c0_98 = arith.constant 0 : index
    %224 = vector.load %arg2[%c3_97, %c0_98] : memref<8x32xf32, #tpu.memory_space<vmem>>, vector<1x32xf32>
    %225 = vector.broadcast %224 : vector<1x32xf32> to vector<16x32xf32>
    %226 = arith.addf %223, %225 : vector<16x32xf32>
    %227 = arith.addf %192, %226 : vector<16x32xf32>
    %c4_99 = arith.constant 4 : index
    %c0_100 = arith.constant 0 : index
    %228 = vector.load %arg2[%c4_99, %c0_100] : memref<8x32xf32, #tpu.memory_space<vmem>>, vector<1x32xf32>
    %c5_101 = arith.constant 5 : index
    %c0_102 = arith.constant 0 : index
    %229 = vector.load %arg2[%c5_101, %c0_102] : memref<8x32xf32, #tpu.memory_space<vmem>>, vector<1x32xf32>
    %cst_103 = arith.constant dense<0.000000e+00> : vector<16xf32>
    %230 = vector.multi_reduction <add>, %227, %cst_103 [1] : vector<16x32xf32> to vector<16xf32>
    %231 = vector.shape_cast %230 : vector<16xf32> to vector<16x1xf32>
    %cst_104 = arith.constant 3.200000e+01 : f32
    %232 = vector.broadcast %cst_104 : f32 to vector<16x1xf32>
    %233 = arith.divf %231, %232 : vector<16x1xf32>
    %234 = vector.broadcast %233 : vector<16x1xf32> to vector<16x32xf32>
    %235 = arith.subf %227, %234 : vector<16x32xf32>
    %236 = arith.mulf %235, %235 : vector<16x32xf32>
    %cst_105 = arith.constant dense<0.000000e+00> : vector<16xf32>
    %237 = vector.multi_reduction <add>, %236, %cst_105 [1] : vector<16x32xf32> to vector<16xf32>
    %238 = vector.shape_cast %237 : vector<16xf32> to vector<16x1xf32>
    %cst_106 = arith.constant 3.200000e+01 : f32
    %239 = vector.broadcast %cst_106 : f32 to vector<16x1xf32>
    %240 = arith.divf %238, %239 : vector<16x1xf32>
    %241 = vector.broadcast %233 : vector<16x1xf32> to vector<16x32xf32>
    %242 = arith.subf %227, %241 : vector<16x32xf32>
    %cst_107 = arith.constant 9.99999974E-6 : f32
    %243 = vector.broadcast %cst_107 : f32 to vector<16x1xf32>
    %244 = arith.addf %240, %243 : vector<16x1xf32>
    %245 = math.rsqrt %244 : vector<16x1xf32>
    %246 = vector.broadcast %245 : vector<16x1xf32> to vector<16x32xf32>
    %247 = arith.mulf %242, %246 : vector<16x32xf32>
    %248 = vector.broadcast %228 : vector<1x32xf32> to vector<16x32xf32>
    %249 = arith.mulf %247, %248 : vector<16x32xf32>
    %250 = vector.broadcast %229 : vector<1x32xf32> to vector<16x32xf32>
    %251 = arith.addf %249, %250 : vector<16x32xf32>
    %c0_108 = arith.constant 0 : index
    %c0_109 = arith.constant 0 : index
    %252 = vector.load %arg3[%c0_108, %c0_109] : memref<33x64xf32, #tpu.memory_space<vmem>>, vector<32x64xf32>
    %cst_110 = arith.constant dense<0.000000e+00> : vector<16x64xf32>
    %253 = tpu.matmul %251, %252, %cst_110 {dimension_numbers = #tpu.dot_dimension_numbers<[1], [0], [0], [1], [0, 0, 1, 1], [], []>} : vector<16x32xf32>, vector<32x64xf32>, vector<16x64xf32> -> vector<16x64xf32>
    %c32_111 = arith.constant 32 : index
    %c0_112 = arith.constant 0 : index
    %254 = vector.load %arg3[%c32_111, %c0_112] : memref<33x64xf32, #tpu.memory_space<vmem>>, vector<1x64xf32>
    %255 = vector.broadcast %254 : vector<1x64xf32> to vector<16x64xf32>
    %256 = arith.addf %253, %255 : vector<16x64xf32>
    %cst_113 = arith.constant 0.000000e+00 : f32
    %257 = vector.broadcast %cst_113 : f32 to vector<16x64xf32>
    %258 = arith.maximumf %256, %257 : vector<16x64xf32>
    %c0_114 = arith.constant 0 : index
    %c0_115 = arith.constant 0 : index
    %259 = vector.load %arg4[%c0_114, %c0_115] : memref<64x32xf32, #tpu.memory_space<vmem>>, vector<64x32xf32>
    %cst_116 = arith.constant dense<0.000000e+00> : vector<16x32xf32>
    %260 = tpu.matmul %258, %259, %cst_116 {dimension_numbers = #tpu.dot_dimension_numbers<[1], [0], [0], [1], [0, 0, 1, 1], [], []>} : vector<16x64xf32>, vector<64x32xf32>, vector<16x32xf32> -> vector<16x32xf32>
    %261 = arith.addf %251, %260 : vector<16x32xf32>
    %c6_117 = arith.constant 6 : index
    %c0_118 = arith.constant 0 : index
    %262 = vector.load %arg2[%c6_117, %c0_118] : memref<8x32xf32, #tpu.memory_space<vmem>>, vector<1x32xf32>
    %263 = vector.broadcast %262 : vector<1x32xf32> to vector<16x32xf32>
    %264 = arith.addf %261, %263 : vector<16x32xf32>
    %c0_119 = arith.constant 0 : index
    %c0_120 = arith.constant 0 : index
    %265 = vector.load %arg6[%c0_119, %c0_120] : memref<16x32xf32, #tpu.memory_space<vmem>>, vector<16x32xf32>
    tpu.vector_store %arg6[%c0_119, %c0_120], %264 {strides = array<i32>} : memref<16x32xf32, #tpu.memory_space<vmem>>, vector<16x32xf32>,
    return
  }
}

</mosaic_0001>

<bundles_post_ra>
// kernel: tpu_custom_call.1
= control target key start
LH: loop header
LB: loop body
LE: loop exit
PB: predicated region body
PF: predicated region fallthrough
CT: control target
= control target key end

     0   :  { %11 = vsyncpa [#allocation3], 0  ;;  %s4586_s0 = inlined_call_operand.vmem [shape: f32[16,32], index: 0, kind: input, shape index: {}]   ;;  %s4587_s1 = inlined_call_operand.vmem [shape: f32[2,32,288], index: 1, kind: input, shape index: {}]   ;;  %s4588_s2 = inlined_call_operand.vmem [shape: f32[8,32], index: 2, kind: input, shape index: {}]   ;;  %s4589_s3 = inlined_call_operand.hbm [shape: f32[33,64], index: 3, kind: input, shape index: {}]   ;;  %s4590_s4 = inlined_call_operand.vmem [shape: f32[64,32], index: 4, kind: input, shape index: {}]   ;;  %s4591_s5 = inlined_call_operand.vmem [shape: f32[112,64], index: 5, kind: input, shape index: {}]   ;;  %s4592_s6 = inlined_call_operand.hbm [shape: f32[16,32], index: 6, kind: output, shape index: {}]  }
   0x1   :  { %12 = vsyncpa [#allocation4], 0  ;;  %s3891_s21 = smov [#allocation2]   ;;  %s3843_s25 = scalar_lea.hbm %s4589_s3, 640 }
   0x2   :  { %s24_s22 = sshll.u32 %s3891_s21, 4  ;;  %p3844_p0 = scmp.ne.s32.totalorder %s4589_s3, %s3843_s25  ;;  %s25_s22 = int_to_ptr.vmem [resolvable:$true] %s24_s22 }
   0x3   :  { %p3847_p1 = scmp.lt.u32.totalorder %s3843_s25, %s4589_s3 }
   0x5   :  { %p3849_p2 = pnand %p3847_p1, %p3844_p0 }
   0x7   :  { %3852 = shalt.err (!%p3849_p2)
}
   0x8   :  { %s3853_s30 = scalar_lea.vmem %s25_s22, 640  ;;  %p3858_p4 = scmp.lt.s32.totalorder %s25_s22, %s25_s22 }
   0x9   :  { %p3854_p3 = scmp.ne.s32.totalorder %s25_s22, %s3853_s30  ;;  %p3859_p5 = scmp.lt.s32.totalorder %s3853_s30, %s3853_s30 }
   0xb   :  { %p3860_p6 = por %p3859_p5, %p3858_p4 }
   0xd   :  { %p3861_p7 = pnand %p3860_p6, %p3854_p3 }
   0xf   :  { %3864 = shalt.err (!%p3861_p7)
}
  0x10   :  { %s3892_s7 = smov 128   ;;  %s3893_s8 = smov 8  }
  0x11   :  { %30 = dma.hbm_to_vmem [thread:$0]  %s4589_s3, 640, %s25_s22, [#allocation3], %s3892_s7, %s3892_s7, %s3893_s8  }
  0x12   :  { %3887 = dma.done.wait [#allocation3], 640  }
  0x13   :  { %3888 = vsyncadd [#allocation3], 4294966656  ;;  %v3894_v0 = vmov 0.0   ;;  %v45_v1 = vld [vmem:[%s4587_s1 + $0x8] sm:$0xff]  ;;  %v48_v2 = vld [vmem:[%s4587_s1 + $0x20] sm:$0xff]  ;;  %vm56_vm0 = vcmask 261120  }
  0x14   :  { %127 = vmatprep.mubr.f32.mxu1 %v3894_v0  ;;  %v44_v3 = vld [vmem:[%s4587_s1] sm:$0xff]  ;;  %v3959_v4 = vpack.c.bf16 %v48_v2, %v45_v1  ;;  %v47_v5 = vld [vmem:[%s4587_s1 + $0x18] sm:$0xff]  ;;  %v54_v7 = vld [vmem:[%s4587_s1 + $0x50] sm:$0xff]  ;;  %s3896_s12 = smov 32   ;;  %s3897_s13 = smov 64   ;;  %vm354_vm2 = vcmask 523264  }
  0x15   :  { %v51_v6 = vld [vmem:[%s4587_s1 + $0x38] sm:$0xff]  ;;  %v3970_v8 = vpack.c.bf16 %v47_v5, %v44_v3  ;;  %v50_v10 = vld [vmem:[%s4587_s1 + $0x30] sm:$0xff]  ;;  %v53_v11 = vld [vmem:[%s4587_s1 + $0x48] sm:$0xff] }
  0x16   :  { %v3972_v9 = vpack.c.bf16 %v54_v7, %v51_v6  ;;  %3208 = vmatprep.subr.bf16.mxu1 %v3959_v4  ;;  %v3982_v12 = vpack.c.bf16 %v53_v11, %v50_v10  ;;  %v38_v13 = vld [vmem:[%s4586_s0] sm:$0xff]  ;;  %v39_v16 = vld [vmem:[%s4586_s0 + $0x8] sm:$0xff]  ;;  %s3895_s0 = smov 96   ;;  %vm4018_vm1 = vmpackc.low %vm56_vm0, %vm56_vm0 }
  0x17   :  { %3210 = vmatpush1.bf16.msra.mxu1 %v3970_v8  ;;  %v40_v14 = vld [vmem:[%s4591_s5 + $0x60] sm:$0xff]  ;;  %v41_v17 = vld [vmem:[%s4591_s5 + $0x68] sm:$0xff]  ;;  %v46_v32 = vld [vmem:[%s4587_s1 + $0x10] sm:$0xff] }
  0x18   :  { %3212 = vmatprep.subr.bf16.mxu1 %v3972_v9  ;;  %v3991_v15 = vadd.f32 %v40_v14, %v38_v13  ;;  %v4002_v18 = vadd.f32 %v41_v17, %v39_v16  ;;  %v49_v33 = vld [vmem:[%s4587_s1 + $0x28] sm:$0xff]  ;;  %v52_v34 = vld [vmem:[%s4587_s1 + $0x40] sm:$0xff]  ;;  %v55_v36 = vld [vmem:[%s4587_s1 + $0x58] sm:$0xff] }
  0x19   :  { %v4038_v35 = vpack.c.bf16 %v49_v33, %v46_v32  ;;  %v4043_v37 = vpack.c.bf16 %v55_v36, %v52_v34  ;;  %v367_v50 = vld [vmem:[%s4591_s5 + $0x20] sm:$0xff]  ;;  %v368_v51 = vld [vmem:[%s4591_s5 + $0x28] sm:$0xff]  ;;  %v369_v52 = vld [vmem:[%s4591_s5 + $0x30] sm:$0xff] }
  0x1a   :  { %v4074_v53 = vpack.c.bf16 %v368_v51, %v367_v50  ;;  %v370_v54 = vld [vmem:[%s4591_s5 + $0x38] sm:$0xff]  ;;  %v4088_v56 = vld [vmem:[%s4591_s5 + $0x8] sm:$0xff]  ;;  %v4093_v57 = vld [vmem:[%s4591_s5] sm:$0xff] }
  0x1b   :  { %3214 = vmatpush1.bf16.msra.mxu1 %v3982_v12  ;;  %v4079_v55 = vpack.c.bf16 %v370_v54, %v369_v52  ;;  %v371_v2 = vld [vmem:[%s4591_s5 + $0x40] sm:$0xff]  ;;  %v372_v3 = vld [vmem:[%s4591_s5 + $0x48] sm:$0xff]  ;;  %v373_v10 = vld [vmem:[%s4591_s5 + $0x50] sm:$0xff] }
  0x1c   :  { %3216 = vmatprep.subr.bf16.mxu1 %v4038_v35  ;;  %v4105_v6 = vpack.c.bf16 %v372_v3, %v371_v2  ;;  %v374_v11 = vld [vmem:[%s4591_s5 + $0x58] sm:$0xff]  ;;  %v3840_v29 = vld [vmem:[%s4591_s5] sm:$0xff] }
  0x1d   :  { %v4117_v13 = vpack.c.bf16 %v374_v11, %v373_v10 }
  0x1e   :  { %2599 = vmatmul.mubr.msk.f32.vlgmr.msra.gmra.mrb[0].mxu1 %vm56_vm0, %v3991_v15 }
  0x1f   :  { %133 = vmatprep.mubr.f32.mxu1 %v3894_v0  ;;  %3218 = vmatpush3.bf16.msra.mxu1 %v4038_v35 }
  0x20   :  { %3220 = vmatprep.subr.bf16.mxu1 %v4043_v37 }
  0x22   :  { %2600 = vmatmul.mubr.msk.f32.gmra.mrb[2].mxu1 %vm56_vm0, %v4002_v18 }
  0x23   :  { %2883 = vmatprep.mubr.msk.f32.mxu1 %vm56_vm0, %v3991_v15  ;;  %3222 = vmatpush3.bf16.msra.mxu1 %v4043_v37 }
  0x24   :  { %3248 = vmatprep.subr.bf16.mxu1 %v4074_v53 }
  0x26   :  { %2884 = vmatmul.mubr.msk.f32.vlgmr.msra.gmra.mrb[4].mxu1 %vm56_vm0, %v4002_v18 }
  0x27   :  { %3250 = vmatpush3.bf16.msra.mxu1 %v4074_v53 }
  0x28   :  { %3252 = vmatprep.subr.bf16.mxu1 %v4079_v55 }
  0x2b   :  { %3254 = vmatpush3.bf16.msra.mxu1 %v4079_v55 }
  0x2c   :  { %3256 = vmatprep.subr.bf16.mxu1 %v4105_v6 }
  0x2f   :  { %3258 = vmatpush3.bf16.msra.mxu1 %v4105_v6 }
  0x30   :  { %3260 = vmatprep.subr.bf16.mxu1 %v4117_v13 }
  0x33   :  { %3262 = vmatpush3.bf16.msra.mxu1 %v4117_v13 }
  0xf1   :  { %v129_v19 = vpop.f32.mrb[0].mxu1 }
  0xf2   :  { %v131_v20 = vpop.f32.mrb[1].mxu1  ;;  %2902 = vmatprep.mubr.msk.f32.mxu0 %vm56_vm0, %v129_v19 }
  0xf5   :  { %v135_v21 = vpop.f32.mrb[2].mxu1 }
  0xf6   :  { %v3556_v22 = vpack.i.bf16 %v135_v21, %v129_v19  ;;  %v137_v23 = vpop.f32.mrb[3].mxu1 }
  0xf7   :  { %v4010_v24 = vpack.i.bf16 %v137_v23, %v131_v20 }
  0xf8   :  { %3552 = vrot.lane.b32.xlu0 %v3556_v22, %s3895_s0 }
  0xf9   :  { %3562 = vrot.lane.b32.xlu1 %v4010_v24, %s3896_s12  ;;  %v2885_v1 = vpop.f32.mrb[4].mxu1 }
  0xfa   :  { %v206_v5 = vpop.f32.mrb[5].mxu1 }
  0xfb   :  { %v3591_v7 = vpack.i.bf16 %v2885_v1, %v206_v5 }
  0xfc   :  { %3557 = vrot.lane.b32.xlu0 %v3556_v22, %s3897_s13 }
 0x16a   :  { %v3553_v25 = vpop.permute.xlu0 %3552 }
 0x16b   :  { %v3555_v26 = vunpack.i.h.bf16 %v3553_v25  ;;  %v3554_v27 = vunpack.i.l.bf16 %v3553_v25  ;;  %v3563_v28 = vpop.permute.xlu1 %3562  ;;  %3567 = vrot.lane.b32.xlu1 %v3553_v25, %s3895_s0 }
 0x16d   :  { %v3223_v30 = vpack.c.bf16 %v3555_v26, %v3554_v27 }
 0x16e   :  { %v3558_v31 = vpop.permute.xlu0 %3557 }
 0x16f   :  { %3225 = vmatprep.subr.msk.bf16.mxu0 %vm4018_vm1, %v3223_v30  ;;  %3572 = vrot.lane.b32.xlu0 %v3558_v31, %s3895_s0 }
 0x170   :  { %3228 = vmatpush3.bf16.xpose.msk.msra.mxu0 %vm4018_vm1, %v3223_v30  ;;  %3577 = vrot.lane.b32.xlu1 %v3563_v28, %s3895_s0 }
 0x1dd   :  { %v3568_v38 = vpop.permute.xlu1 %3567 }
 0x1de   :  { %v3570_v39 = vunpack.i.h.bf16 %v3568_v38  ;;  %v3569_v40 = vunpack.i.l.bf16 %v3568_v38 }
 0x1e0   :  { %v3229_v41 = vpack.c.bf16 %v3570_v39, %v3569_v40 }
 0x1e1   :  { %v3573_v42 = vpop.permute.xlu0 %3572 }
 0x1e2   :  { %v3575_v43 = vunpack.i.h.bf16 %v3573_v42  ;;  %v3574_v44 = vunpack.i.l.bf16 %v3573_v42  ;;  %3231 = vmatprep.subr.msk.bf16.mxu0 %vm4018_vm1, %v3229_v41  ;;  %v3578_v45 = vpop.permute.xlu1 %3577 }
 0x1e3   :  { %3234 = vmatpush3.bf16.xpose.msk.msra.mxu0 %vm4018_vm1, %v3229_v41  ;;  %v3580_v47 = vunpack.i.h.bf16 %v3578_v45  ;;  %v3579_v48 = vunpack.i.l.bf16 %v3578_v45  ;;  %v4132_v45 = vld [vmem:[%s4591_s5 + $0x18] sm:$0xff] }
 0x1e4   :  { %v3235_v46 = vpack.c.bf16 %v3575_v43, %v3574_v44 }
 0x1e5   :  { %v3241_v49 = vpack.c.bf16 %v3580_v47, %v3579_v48 }
 0x1e6   :  { %3237 = vmatprep.subr.msk.bf16.mxu0 %vm4018_vm1, %v3235_v46 }
 0x1eb   :  { %3240 = vmatpush3.bf16.xpose.msk.msra.mxu0 %vm4018_vm1, %v3235_v46  ;;  %v4137_v46 = vld [vmem:[%s4591_s5 + $0x10] sm:$0xff] }
 0x1ec   :  { %3243 = vmatprep.subr.msk.bf16.mxu0 %vm4018_vm1, %v3241_v49 }
 0x1f3   :  { %3246 = vmatpush3.bf16.xpose.msk.msra.mxu0 %vm4018_vm1, %v3241_v49 }
 0x1fa   :  { %2903 = vmatmul.mubr.msk.f32.vlgmr.msra.gmra.mrb[0].mxu0 %vm56_vm0, %v135_v21 }
 0x1fb   :  { %696 = vmatprep.mubr.f32.mxu0 %v3894_v0 }
 0x2cd   :  { %v2904_v58 = vpop.f32.mrb[0].mxu0 }
 0x2ce   :  { %v351_v59 = vadd.f32 %v2904_v58, %v4088_v56  ;;  %v345_v60 = vpop.f32.mrb[1].mxu0 }
 0x2cf   :  { %v346_v61 = vadd.f32 %v345_v60, %v4093_v57 }
 0x2d0   :  { %v358_v62 = vsel %vm354_vm2, %v351_v59, -inf }
 0x2d1   :  { %359 = vmax.xlane.f32.xlu1 %v358_v62  ;;  %v355_v63 = vsel %vm354_vm2, %v346_v61, -inf }
 0x2d2   :  { %356 = vmax.xlane.f32.xlu0 %v355_v63 }
 0x2e2   :  { %3587 = vrot.lane.b32.xlu1 %v4010_v24, %s3897_s13 }
 0x2e8   :  { %3582 = vrot.lane.b32.xlu0 %v4010_v24, %s3895_s0 }
 0x2ec   :  { %3592 = vrot.lane.b32.xlu0 %v3591_v7, %s3896_s12 }
 0x35e   :  { %v360_v14 = vpop.xlane.xlu1 %359 }
 0x35f   :  { %v362_v16 = vsub.f32 %v351_v59, %v360_v14  ;;  %v357_v17 = vpop.xlane.xlu0 %356 }
 0x360   :  { %v361_v19 = vsub.f32 %v346_v61, %v357_v17  ;;  %v4146_v61 = vld [vmem:[%s4588_s2] ss:$0 sm:$0xff] }
 0x361   :  { %v365_v20 = vmul.f32 1.442695, %v362_v16 }
 0x362   :  { %v363_v21 = vmul.f32 1.442695, %v361_v19  ;;  %v3588_v22 = vpop.permute.xlu1 %3587 }
 0x363   :  { %v3583_v23 = vpop.permute.xlu0 %3582  ;;  %3602 = vrot.lane.b32.xlu0 %v3588_v22, %s3895_s0 }
 0x364   :  { %3791 = vpow2.f32 %v363_v21  ;;  %v3585_v25 = vunpack.i.h.bf16 %v3583_v23  ;;  %v3584_v26 = vunpack.i.l.bf16 %v3583_v23  ;;  %3597 = vrot.lane.b32.xlu1 %v3583_v23, %s3895_s0 }
 0x365   :  { %3793 = vpow2.f32 %v365_v20 }
 0x366   :  { %v3263_v27 = vpack.c.bf16 %v3585_v25, %v3584_v26  ;;  %v2624_v25 = vld [vmem:[%s4587_s1 + $0x80] sm:$0xff] }
 0x367   :  { %v3593_v28 = vpop.permute.xlu0 %3592 }
 0x368   :  { %3264 = vmatprep.subr.bf16.mxu1 %v3263_v27  ;;  %3607 = vrot.lane.b32.xlu1 %v3593_v28, %s3895_s0  ;;  %v2623_v28 = vld [vmem:[%s4587_s1 + $0x78] sm:$0xff] }
 0x36e   :  { %v3792_v24 = vpop.eup %3791 }
 0x36f   :  { %v3794_v30 = vpop.eup %3793  ;;  %2921 = vmatprep.mubr.msk.f32.mxu1 %vm354_vm2, %v3792_v24 }
 0x370   :  { %2922 = vmatmul.mubr.msk.f32.vlgmr.msra.gmra.mrb[6].mxu1 %vm354_vm2, %v3794_v30 }
 0x371   :  { %3266 = vmatpush3.bf16.msra.mxu1 %v3263_v27  ;;  %v2620_v27 = vld [vmem:[%s4587_s1 + $0x60] sm:$0xff] }
 0x3d5   :  { %v3603_v31 = vpop.permute.xlu0 %3602 }
 0x3d6   :  { %v3598_v32 = vpop.permute.xlu1 %3597  ;;  %v3605_v33 = vunpack.i.h.bf16 %v3603_v31  ;;  %v3604_v34 = vunpack.i.l.bf16 %v3603_v31  ;;  %v2630_v31 = vld [vmem:[%s4587_s1 + $0xb0] sm:$0xff] }
 0x3d7   :  { %v3600_v36 = vunpack.i.h.bf16 %v3598_v32  ;;  %v3599_v38 = vunpack.i.l.bf16 %v3598_v32  ;;  %v2622_v32 = vld [vmem:[%s4587_s1 + $0x70] sm:$0xff] }
 0x3d8   :  { %v3271_v41 = vpack.c.bf16 %v3605_v33, %v3604_v34  ;;  %v2625_v34 = vld [vmem:[%s4587_s1 + $0x88] sm:$0xff] }
 0x3d9   :  { %v3267_v39 = vpack.c.bf16 %v3600_v36, %v3599_v38  ;;  %v2626_v36 = vld [vmem:[%s4587_s1 + $0x90] sm:$0xff]  ;;  %v2629_v38 = vld [vmem:[%s4587_s1 + $0xa8] sm:$0xff] }
 0x3da   :  { %v3608_v40 = vpop.permute.xlu1 %3607 }
 0x3db   :  { %3268 = vmatprep.subr.bf16.mxu1 %v3267_v39  ;;  %v3610_v42 = vunpack.i.h.bf16 %v3608_v40  ;;  %v3609_v43 = vunpack.i.l.bf16 %v3608_v40  ;;  %v4196_v40 = vpack.c.bf16 %v2629_v38, %v2626_v36 }
 0x3dc   :  { %3270 = vmatpush3.bf16.msra.mxu1 %v3267_v39  ;;  %v4194_v39 = vpack.c.bf16 %v2625_v34, %v2622_v32 }
 0x3dd   :  { %3272 = vmatprep.subr.bf16.mxu1 %v3271_v41  ;;  %v3275_v44 = vpack.c.bf16 %v3610_v42, %v3609_v43  ;;  %v2631_v42 = vld [vmem:[%s4587_s1 + $0xb8] sm:$0xff] }
 0x3e0   :  { %3274 = vmatpush3.bf16.msra.mxu1 %v3271_v41  ;;  %v2628_v41 = vld [vmem:[%s4587_s1 + $0xa0] sm:$0xff] }
 0x3e1   :  { %3276 = vmatprep.subr.bf16.mxu1 %v3275_v44  ;;  %v4208_v43 = vpack.c.bf16 %v2631_v42, %v2628_v41 }
 0x3e4   :  { %3278 = vmatpush3.bf16.msra.mxu1 %v3275_v44 }
 0x3e5   :  { %3288 = vmatprep.subr.bf16.mxu1 %v4194_v39 }
 0x443   :  { %v2923_v47 = vpop.f32.mrb[6].mxu1 }
 0x444   :  { %v455_v48 = vadd.f32 %v2923_v47, %v4132_v45  ;;  %v449_v49 = vpop.f32.mrb[7].mxu1 }
 0x445   :  { %v450_v50 = vadd.f32 %v449_v49, %v4137_v46 }
 0x446   :  { %v459_v51 = vmax.f32 %v455_v48, 1e-30 }
 0x447   :  { %v458_v52 = vmax.f32 %v450_v50, 1e-30 }
 0x448   :  { %3795 = vrcp.f32 %v459_v51 }
 0x449   :  { %3797 = vrcp.f32 %v458_v52 }
 0x452   :  { %v3796_v54 = vpop.eup %3795 }
 0x453   :  { %v3798_v58 = vpop.eup %3797  ;;  %v463_v60 = vmul.f32 %v3796_v54, %v3794_v30  ;;  %v2627_v30 = vld [vmem:[%s4587_s1 + $0x98] sm:$0xff]  ;;  %v4216_v54 = vld [vmem:[%s4588_s2 + $0x1] ss:$0 sm:$0xff] }
 0x454   :  { %v462_v59 = vmul.f32 %v3798_v58, %v3792_v24  ;;  %v4170_v24 = vpack.c.bf16 %v2623_v28, %v2620_v27  ;;  %v4183_v33 = vpack.c.bf16 %v2630_v31, %v2627_v30 }
 0x456   :  { %2940 = vmatprep.mubr.msk.f32.mxu1 %vm354_vm2, %v462_v59  ;;  %v4221_v59 = vld [vmem:[%s4588_s2 + $0x2] ss:$0 sm:$0xff] }
 0x457   :  { %2941 = vmatmul.mubr.msk.f32.vlgmr.msra.gmra.mrb[8].mxu1 %vm354_vm2, %v463_v60 }
 0x458   :  { %3290 = vmatpush3.bf16.msra.mxu1 %v4194_v39 }
 0x459   :  { %3292 = vmatprep.subr.bf16.mxu1 %v4208_v43 }
 0x45c   :  { %3294 = vmatpush3.bf16.msra.mxu1 %v4208_v43 }
 0x45d   :  { %3320 = vmatprep.subr.bf16.mxu1 %v4074_v53 }
 0x52a   :  { %v2942_v62 = vpop.f32.mrb[8].mxu1 }
 0x52b   :  { %v567_v63 = vadd.f32 %v2942_v62, %v4146_v61  ;;  %v561_v1 = vpop.f32.mrb[9].mxu1 }
 0x52c   :  { %v562_v2 = vadd.f32 %v4146_v61, %v561_v1 }
 0x52d   :  { %v571_v3 = vadd.f32 %v567_v63, %v4002_v18 }
 0x52e   :  { %v570_v5 = vadd.f32 %v562_v2, %v3991_v15  ;;  %v2621_v15 = vld [vmem:[%s4587_s1 + $0x68] sm:$0xff] }
 0x52f   :  { %v577_v7 = vsel %vm56_vm0, %v571_v3, 0.0  ;;  %v4162_v26 = vpack.c.bf16 %v2624_v25, %v2621_v15 }
 0x530   :  { %578 = vadd.xlane.f32.xlu1 %v577_v7  ;;  %v574_v10 = vsel %vm56_vm0, %v570_v5, 0.0 }
 0x531   :  { %575 = vadd.xlane.f32.xlu0 %v574_v10  ;;  %3280 = vmatprep.subr.bf16.mxu0 %v4162_v26 }
 0x532   :  { %3282 = vmatpush1.bf16.msra.mxu0 %v4170_v24 }
 0x533   :  { %3284 = vmatprep.subr.bf16.mxu0 %v4183_v33 }
 0x536   :  { %3286 = vmatpush1.bf16.msra.mxu0 %v4196_v40 }
 0x5bd   :  { %v579_v11 = vpop.xlane.xlu1 %578 }
 0x5be   :  { %v582_v14 = vmul.f32 0.03125, %v579_v11  ;;  %v576_v16 = vpop.xlane.xlu0 %575 }
 0x5bf   :  { %v581_v17 = vmul.f32 0.03125, %v576_v16 }
 0x5c0   :  { %v584_v19 = vsub.f32 %v571_v3, %v582_v14 }
 0x5c1   :  { %v583_v20 = vsub.f32 %v570_v5, %v581_v17 }
 0x5c2   :  { %v586_v23 = vmul.f32 %v584_v19, %v584_v19 }
 0x5c3   :  { %v585_v21 = vmul.f32 %v583_v20, %v583_v20 }
 0x5c4   :  { %v590_v18 = vsel %vm56_vm0, %v586_v23, 0.0 }
 0x5c5   :  { %v587_v22 = vsel %vm56_vm0, %v585_v21, 0.0 }
 0x5c6   :  { %588 = vadd.xlane.f32.xlu0 %v587_v22 }
 0x5ca   :  { %591 = vadd.xlane.f32.xlu0 %v590_v18 }
 0x653   :  { %v589_v44 = vpop.xlane.xlu0 %588 }
 0x654   :  { %v593_v47 = vmul.f32 0.03125, %v589_v44 }
 0x656   :  { %v595_v48 = vadd.f32 1e-05, %v593_v47 }
 0x657   :  { %v592_v49 = vpop.xlane.xlu0 %591 }
 0x658   :  { %3799 = vrsqrt.f32 %v595_v48  ;;  %v594_v50 = vmul.f32 0.03125, %v592_v49 }
 0x65a   :  { %v596_v51 = vadd.f32 1e-05, %v594_v50 }
 0x65c   :  { %3801 = vrsqrt.f32 %v596_v51 }
 0x662   :  { %v3800_v52 = vpop.eup %3799 }
 0x663   :  { %v599_v58 = vmul.f32 %v3800_v52, %v583_v20 }
 0x665   :  { %v605_v60 = vmul.f32 %v4216_v54, %v599_v58 }
 0x666   :  { %v3802_v62 = vpop.eup %3801 }
 0x667   :  { %v4225_v63 = vadd.f32 %v4221_v59, %v605_v60  ;;  %v600_v1 = vmul.f32 %v3802_v62, %v584_v19 }
 0x669   :  { %2632 = vmatmul.mubr.msk.f32.vlgmr.msra.gmra.mrb[2].mxu0 %vm56_vm0, %v4225_v63  ;;  %2951 = vmatprep.mubr.msk.f32.mxu1 %vm56_vm0, %v4225_v63  ;;  %v606_v2 = vmul.f32 %v4216_v54, %v600_v1 }
 0x66a   :  { %702 = vmatprep.mubr.f32.mxu0 %v3894_v0 }
 0x66b   :  { %v4234_v3 = vadd.f32 %v4221_v59, %v606_v2 }
 0x66d   :  { %2633 = vmatmul.mubr.msk.f32.gmra.mrb[4].mxu0 %vm56_vm0, %v4234_v3  ;;  %2952 = vmatmul.mubr.msk.f32.vlgmr.msra.gmra.mrb[10].mxu1 %vm56_vm0, %v4234_v3 }
 0x66e   :  { %3322 = vmatpush3.bf16.msra.mxu1 %v4074_v53 }
 0x66f   :  { %3324 = vmatprep.subr.bf16.mxu1 %v4079_v55 }
 0x672   :  { %3326 = vmatpush3.bf16.msra.mxu1 %v4079_v55 }
 0x673   :  { %3328 = vmatprep.subr.bf16.mxu1 %v4105_v6 }
 0x676   :  { %3330 = vmatpush3.bf16.msra.mxu1 %v4105_v6 }
 0x677   :  { %3332 = vmatprep.subr.bf16.mxu1 %v4117_v13 }
 0x67a   :  { %3334 = vmatpush3.bf16.msra.mxu1 %v4117_v13 }
 0x73c   :  { %v698_v5 = vpop.f32.mrb[2].mxu0 }
 0x73d   :  { %v700_v7 = vpop.f32.mrb[3].mxu0  ;;  %2970 = vmatprep.mubr.msk.f32.mxu0 %vm56_vm0, %v698_v5 }
 0x740   :  { %v704_v10 = vpop.f32.mrb[4].mxu0  ;;  %v2953_v11 = vpop.f32.mrb[10].mxu1 }
 0x741   :  { %v3616_v14 = vpack.i.bf16 %v704_v10, %v698_v5  ;;  %v706_v16 = vpop.f32.mrb[5].mxu0  ;;  %v775_v17 = vpop.f32.mrb[11].mxu1 }
 0x742   :  { %v3646_v19 = vpack.i.bf16 %v706_v16, %v700_v7  ;;  %v3651_v20 = vpack.i.bf16 %v2953_v11, %v775_v17 }
 0x743   :  { %3617 = vrot.lane.b32.xlu0 %v3616_v14, %s3897_s13  ;;  %3612 = vrot.lane.b32.xlu1 %v3616_v14, %s3895_s0 }
 0x747   :  { %3622 = vrot.lane.b32.xlu1 %v3646_v19, %s3896_s12 }
 0x7b5   :  { %v3618_v21 = vpop.permute.xlu0 %3617  ;;  %v3613_v22 = vpop.permute.xlu1 %3612 }
 0x7b6   :  { %v3615_v23 = vunpack.i.h.bf16 %v3613_v22  ;;  %v3614_v18 = vunpack.i.l.bf16 %v3613_v22  ;;  %3632 = vrot.lane.b32.xlu0 %v3618_v21, %s3895_s0  ;;  %3627 = vrot.lane.b32.xlu1 %v3613_v22, %s3895_s0 }
 0x7b8   :  { %v3295_v15 = vpack.c.bf16 %v3615_v23, %v3614_v18 }
 0x7b9   :  { %v3623_v25 = vpop.permute.xlu1 %3622 }
 0x7ba   :  { %3297 = vmatprep.subr.msk.bf16.mxu0 %vm4018_vm1, %v3295_v15  ;;  %3637 = vrot.lane.b32.xlu1 %v3623_v25, %s3895_s0 }
 0x7bb   :  { %3300 = vmatpush3.bf16.xpose.msk.msra.mxu0 %vm4018_vm1, %v3295_v15 }
 0x828   :  { %v3633_v27 = vpop.permute.xlu0 %3632  ;;  %v3628_v28 = vpop.permute.xlu1 %3627 }
 0x829   :  { %v3635_v30 = vunpack.i.h.bf16 %v3633_v27  ;;  %v3634_v31 = vunpack.i.l.bf16 %v3633_v27  ;;  %v3630_v32 = vunpack.i.h.bf16 %v3628_v28  ;;  %v3629_v34 = vunpack.i.l.bf16 %v3628_v28 }
 0x82b   :  { %v3301_v36 = vpack.c.bf16 %v3630_v32, %v3629_v34  ;;  %v3307_v38 = vpack.c.bf16 %v3635_v30, %v3634_v31 }
 0x82c   :  { %v3638_v41 = vpop.permute.xlu1 %3637 }
 0x82d   :  { %3303 = vmatprep.subr.msk.bf16.mxu0 %vm4018_vm1, %v3301_v36  ;;  %v3640_v42 = vunpack.i.h.bf16 %v3638_v41  ;;  %v3639_v44 = vunpack.i.l.bf16 %v3638_v41 }
 0x82e   :  { %3306 = vmatpush3.bf16.xpose.msk.msra.mxu0 %vm4018_vm1, %v3301_v36 }
 0x82f   :  { %3309 = vmatprep.subr.msk.bf16.mxu0 %vm4018_vm1, %v3307_v38  ;;  %v3313_v47 = vpack.c.bf16 %v3640_v42, %v3639_v44 }
 0x836   :  { %3312 = vmatpush3.bf16.xpose.msk.msra.mxu0 %vm4018_vm1, %v3307_v38 }
 0x837   :  { %3315 = vmatprep.subr.msk.bf16.mxu0 %vm4018_vm1, %v3313_v47 }
 0x83e   :  { %3318 = vmatpush3.bf16.xpose.msk.msra.mxu0 %vm4018_vm1, %v3313_v47 }
 0x845   :  { %2971 = vmatmul.mubr.msk.f32.vlgmr.msra.gmra.mrb[6].mxu0 %vm56_vm0, %v704_v10 }
 0x918   :  { %v2972_v48 = vpop.f32.mrb[6].mxu0 }
 0x919   :  { %v918_v49 = vadd.f32 %v2972_v48, %v4088_v56  ;;  %v912_v50 = vpop.f32.mrb[7].mxu0 }
 0x91a   :  { %v913_v51 = vadd.f32 %v912_v50, %v4093_v57 }
 0x91b   :  { %v924_v52 = vsel %vm354_vm2, %v918_v49, -inf }
 0x91c   :  { %925 = vmax.xlane.f32.xlu1 %v924_v52  ;;  %v921_v58 = vsel %vm354_vm2, %v913_v51, -inf }
 0x91d   :  { %922 = vmax.xlane.f32.xlu0 %v921_v58  ;;  %v4290_v58 = vld [vmem:[%s4588_s2 + $0x3] ss:$0 sm:$0xff] }
 0x92d   :  { %3647 = vrot.lane.b32.xlu1 %v3646_v19, %s3897_s13 }
 0x933   :  { %3642 = vrot.lane.b32.xlu0 %v3646_v19, %s3895_s0 }
 0x937   :  { %3652 = vrot.lane.b32.xlu0 %v3651_v20, %s3896_s12 }
 0x9a9   :  { %v926_v60 = vpop.xlane.xlu1 %925 }
 0x9aa   :  { %v928_v62 = vsub.f32 %v918_v49, %v926_v60  ;;  %v923_v1 = vpop.xlane.xlu0 %922 }
 0x9ab   :  { %v927_v2 = vsub.f32 %v913_v51, %v923_v1 }
 0x9ac   :  { %v931_v5 = vmul.f32 1.442695, %v928_v62 }
 0x9ad   :  { %v929_v7 = vmul.f32 1.442695, %v927_v2  ;;  %v3648_v10 = vpop.permute.xlu1 %3647 }
 0x9ae   :  { %v3643_v11 = vpop.permute.xlu0 %3642  ;;  %3662 = vrot.lane.b32.xlu0 %v3648_v10, %s3895_s0 }
 0x9af   :  { %3803 = vpow2.f32 %v929_v7  ;;  %v3645_v14 = vunpack.i.h.bf16 %v3643_v11  ;;  %v3644_v16 = vunpack.i.l.bf16 %v3643_v11  ;;  %3657 = vrot.lane.b32.xlu1 %v3643_v11, %s3895_s0 }
 0x9b0   :  { %3805 = vpow2.f32 %v931_v5 }
 0x9b1   :  { %v3335_v17 = vpack.c.bf16 %v3645_v14, %v3644_v16 }
 0x9b2   :  { %v3653_v21 = vpop.permute.xlu0 %3652 }
 0x9b3   :  { %3336 = vmatprep.subr.bf16.mxu1 %v3335_v17  ;;  %3667 = vrot.lane.b32.xlu1 %v3653_v21, %s3895_s0 }
 0x9b9   :  { %v3804_v19 = vpop.eup %3803 }
 0x9ba   :  { %v3806_v20 = vpop.eup %3805  ;;  %2989 = vmatprep.mubr.msk.f32.mxu1 %vm354_vm2, %v3804_v19 }
 0x9bb   :  { %2990 = vmatmul.mubr.msk.f32.vlgmr.msra.gmra.mrb[12].mxu1 %vm354_vm2, %v3806_v20 }
 0x9bc   :  { %3338 = vmatpush3.bf16.msra.mxu1 %v3335_v17 }
 0xa20   :  { %v3663_v22 = vpop.permute.xlu0 %3662 }
 0xa21   :  { %v3658_v23 = vpop.permute.xlu1 %3657  ;;  %v3665_v18 = vunpack.i.h.bf16 %v3663_v22  ;;  %v3664_v15 = vunpack.i.l.bf16 %v3663_v22 }
 0xa22   :  { %v3660_v25 = vunpack.i.h.bf16 %v3658_v23  ;;  %v3659_v27 = vunpack.i.l.bf16 %v3658_v23 }
 0xa23   :  { %v3343_v31 = vpack.c.bf16 %v3665_v18, %v3664_v15  ;;  %v1169_v15 = vld [vmem:[#allocation2 + $0x8] sm:$0xff] }
 0xa24   :  { %v3339_v28 = vpack.c.bf16 %v3660_v25, %v3659_v27  ;;  %v1170_v27 = vld [vmem:[#allocation2 + $0x10] sm:$0xff] }
 0xa25   :  { %v3668_v30 = vpop.permute.xlu1 %3667 }
 0xa26   :  { %v3670_v32 = vunpack.i.h.bf16 %v3668_v30  ;;  %v3669_v34 = vunpack.i.l.bf16 %v3668_v30  ;;  %3340 = vmatprep.subr.bf16.mxu1 %v3339_v28 }
 0xa27   :  { %3342 = vmatpush3.bf16.msra.mxu1 %v3339_v28  ;;  %v1171_v28 = vld [vmem:[#allocation2 + $0x18] sm:$0xff] }
 0xa28   :  { %3344 = vmatprep.subr.bf16.mxu1 %v3343_v31  ;;  %v3347_v36 = vpack.c.bf16 %v3670_v32, %v3669_v34  ;;  %v4304_v30 = vpack.c.bf16 %v1171_v28, %v1170_v27  ;;  %v1261_v32 = vld [vmem:[%s4590_s4 + $0x8] sm:$0xff]  ;;  %v1262_v34 = vld [vmem:[%s4590_s4 + $0x10] sm:$0xff] }
 0xa2b   :  { %3346 = vmatpush3.bf16.msra.mxu1 %v3343_v31  ;;  %v1260_v31 = vld [vmem:[%s4590_s4] sm:$0xff] }
 0xa2c   :  { %3348 = vmatprep.subr.bf16.mxu1 %v3347_v36 }
 0xa2f   :  { %3350 = vmatpush3.bf16.msra.mxu1 %v3347_v36  ;;  %v4318_v36 = vpack.c.bf16 %v1261_v32, %v1260_v31 }
 0xa31   :  { %3360 = vmatprep.subr.bf16.mxu1 %v4318_v36 }
 0xa8e   :  { %v2991_v38 = vpop.f32.mrb[12].mxu1 }
 0xa8f   :  { %v1011_v41 = vadd.f32 %v2991_v38, %v4132_v45  ;;  %v1005_v42 = vpop.f32.mrb[13].mxu1  ;;  %v1263_v38 = vld [vmem:[%s4590_s4 + $0x18] sm:$0xff] }
 0xa90   :  { %v1006_v44 = vadd.f32 %v1005_v42, %v4137_v46  ;;  %v1265_v42 = vld [vmem:[%s4590_s4 + $0x28] sm:$0xff] }
 0xa91   :  { %v1015_v47 = vmax.f32 %v1011_v41, 1e-30  ;;  %v4323_v41 = vpack.c.bf16 %v1263_v38, %v1262_v34 }
 0xa92   :  { %v1014_v48 = vmax.f32 %v1006_v44, 1e-30 }
 0xa93   :  { %3807 = vrcp.f32 %v1015_v47 }
 0xa94   :  { %3809 = vrcp.f32 %v1014_v48 }
 0xa9d   :  { %v3808_v49 = vpop.eup %3807 }
 0xa9e   :  { %v3810_v50 = vpop.eup %3809  ;;  %v1019_v52 = vmul.f32 %v3808_v49, %v3806_v20 }
 0xa9f   :  { %v1018_v51 = vmul.f32 %v3810_v50, %v3804_v19 }
 0xaa1   :  { %3008 = vmatprep.mubr.msk.f32.mxu1 %vm354_vm2, %v1018_v51 }
 0xaa2   :  { %3009 = vmatmul.mubr.msk.f32.vlgmr.msra.gmra.mrb[14].mxu1 %vm354_vm2, %v1019_v52 }
 0xaa3   :  { %3362 = vmatpush3.bf16.msra.mxu1 %v4318_v36 }
 0xaa4   :  { %3364 = vmatprep.subr.bf16.mxu1 %v4323_v41 }
 0xaa7   :  { %3366 = vmatpush3.bf16.msra.mxu1 %v4323_v41 }
 0xb75   :  { %v3010_v60 = vpop.f32.mrb[14].mxu1 }
 0xb76   :  { %v1123_v62 = vadd.f32 %v3010_v60, %v4290_v58  ;;  %v1117_v1 = vpop.f32.mrb[15].mxu1 }
 0xb77   :  { %v1118_v2 = vadd.f32 %v4290_v58, %v1117_v1 }
 0xb78   :  { %v1127_v5 = vadd.f32 %v1123_v62, %v4234_v3  ;;  %v4342_v62 = vld [vmem:[%s4588_s2 + $0x4] ss:$0 sm:$0xff] }
 0xb79   :  { %v1126_v7 = vadd.f32 %v1118_v2, %v4225_v63  ;;  %v1168_v63 = vld [vmem:[#allocation2] sm:$0xff] }
 0xb7a   :  { %v1133_v10 = vsel %vm56_vm0, %v1127_v5, 0.0  ;;  %v4300_v25 = vpack.c.bf16 %v1169_v15, %v1168_v63  ;;  %v4347_v2 = vld [vmem:[%s4588_s2 + $0x5] ss:$0 sm:$0xff]  ;;  %v4379_v63 = vld [vmem:[%s4588_s2 + $0x6] ss:$0 sm:$0xff] }
 0xb7b   :  { %1134 = vadd.xlane.f32.xlu1 %v1133_v10  ;;  %v1130_v11 = vsel %vm56_vm0, %v1126_v7, 0.0 }
 0xb7c   :  { %1131 = vadd.xlane.f32.xlu0 %v1130_v11  ;;  %3352 = vmatprep.subr.bf16.mxu0 %v4300_v25 }
 0xb7d   :  { %3354 = vmatpush3.bf16.msra.mxu0 %v4300_v25 }
 0xb7e   :  { %3356 = vmatprep.subr.bf16.mxu0 %v4304_v30 }
 0xb81   :  { %3358 = vmatpush3.bf16.msra.mxu0 %v4304_v30 }
 0xb82   :  { %3376 = vmatprep.subr.bf16.mxu0 %v3959_v4  ;;  %v1264_v4 = vld [vmem:[%s4590_s4 + $0x20] sm:$0xff] }
 0xb83   :  { %v4334_v44 = vpack.c.bf16 %v1265_v42, %v1264_v4 }
 0xb85   :  { %3368 = vmatprep.subr.bf16.mxu1 %v4334_v44 }
 0xb86   :  { %3370 = vmatpush3.bf16.msra.mxu1 %v4334_v44 }
 0xc08   :  { %v1135_v14 = vpop.xlane.xlu1 %1134 }
 0xc09   :  { %v1137_v16 = vmul.f32 0.03125, %v1135_v14  ;;  %v1132_v17 = vpop.xlane.xlu0 %1131 }
 0xc0a   :  { %v1136_v21 = vmul.f32 0.03125, %v1132_v17  ;;  %v1266_v17 = vld [vmem:[%s4590_s4 + $0x30] sm:$0xff] }
 0xc0b   :  { %v1139_v19 = vsub.f32 %v1127_v5, %v1137_v16 }
 0xc0c   :  { %v1138_v20 = vsub.f32 %v1126_v7, %v1136_v21  ;;  %v1267_v21 = vld [vmem:[%s4590_s4 + $0x38] sm:$0xff] }
 0xc0d   :  { %v1141_v18 = vmul.f32 %v1139_v19, %v1139_v19 }
 0xc0e   :  { %v1140_v22 = vmul.f32 %v1138_v20, %v1138_v20 }
 0xc0f   :  { %v1145_v3 = vsel %vm56_vm0, %v1141_v18, 0.0 }
 0xc10   :  { %v1142_v23 = vsel %vm56_vm0, %v1140_v22, 0.0 }
 0xc11   :  { %1143 = vadd.xlane.f32.xlu0 %v1142_v23 }
 0xc15   :  { %1146 = vadd.xlane.f32.xlu0 %v1145_v3 }
 0xc9e   :  { %v1144_v47 = vpop.xlane.xlu0 %1143 }
 0xc9f   :  { %v1148_v48 = vmul.f32 0.03125, %v1144_v47 }
 0xca1   :  { %v1150_v49 = vadd.f32 1e-05, %v1148_v48 }
 0xca2   :  { %v1147_v50 = vpop.xlane.xlu0 %1146 }
 0xca3   :  { %3811 = vrsqrt.f32 %v1150_v49  ;;  %v1149_v51 = vmul.f32 0.03125, %v1147_v50 }
 0xca5   :  { %v1151_v52 = vadd.f32 1e-05, %v1149_v51 }
 0xca7   :  { %3813 = vrsqrt.f32 %v1151_v52 }
 0xcad   :  { %v3812_v60 = vpop.eup %3811 }
 0xcae   :  { %v1154_v1 = vmul.f32 %v3812_v60, %v1138_v20 }
 0xcb0   :  { %v1160_v5 = vmul.f32 %v4342_v62, %v1154_v1 }
 0xcb1   :  { %v3814_v7 = vpop.eup %3813 }
 0xcb2   :  { %v1155_v10 = vmul.f32 %v3814_v7, %v1139_v19  ;;  %v1166_v11 = vadd.f32 %v4347_v2, %v1160_v5  ;;  %v4366_v19 = vpack.c.bf16 %v1267_v21, %v1266_v17 }
 0xcb4   :  { %3019 = vmatprep.mubr.msk.f32.mxu0 %vm56_vm0, %v1166_v11  ;;  %v1161_v14 = vmul.f32 %v4342_v62, %v1155_v10  ;;  %3372 = vmatprep.subr.bf16.mxu1 %v4366_v19 }
 0xcb5   :  { %3374 = vmatpush3.bf16.msra.mxu1 %v4366_v19 }
 0xcb6   :  { %v1167_v16 = vadd.f32 %v4347_v2, %v1161_v14 }
 0xcb8   :  { %3020 = vmatmul.mubr.msk.f32.vlgmr.msra.gmra.mrb[8].mxu0 %vm56_vm0, %v1167_v16 }
 0xcb9   :  { %3378 = vmatpush1.bf16.msra.mxu0 %v3970_v8  ;;  %1428 = vmatprep.mubr.f32.mxu0 %v3894_v0  ;;  %v4370_v8 = vld [vmem:[#allocation2 + $0x20] ss:$0 sm:$0xff] }
 0xcba   :  { %3380 = vmatprep.subr.bf16.mxu0 %v3972_v9 }
 0xcbd   :  { %3382 = vmatpush1.bf16.msra.mxu0 %v3982_v12 }
 0xcbe   :  { %3384 = vmatprep.subr.bf16.mxu0 %v4038_v35 }
 0xd8b   :  { %v3021_v9 = vpop.f32.mrb[8].mxu0 }
 0xd8c   :  { %v1255_v12 = vadd.f32 %v3021_v9, %v4370_v8  ;;  %v1249_v20 = vpop.f32.mrb[9].mxu0 }
 0xd8d   :  { %v1250_v22 = vadd.f32 %v4370_v8, %v1249_v20 }
 0xd8e   :  { %v1259_v18 = vmax.f32 %v1255_v12, 0.0 }
 0xd8f   :  { %v1258_v23 = vmax.f32 %v1250_v22, 0.0 }
 0xd91   :  { %3038 = vmatprep.mubr.msk.f32.mxu1 %vm354_vm2, %v1258_v23 }
 0xd92   :  { %3039 = vmatmul.mubr.msk.f32.vlgmr.msra.gmra.mrb[16].mxu1 %vm354_vm2, %v1259_v18 }
 0xe65   :  { %v3040_v3 = vpop.f32.mrb[16].mxu1 }
 0xe66   :  { %v1340_v15 = vpop.f32.mrb[17].mxu1  ;;  %v1350_v28 = vadd.f32 %v3040_v3, %v1167_v16 }
 0xe67   :  { %v1349_v27 = vadd.f32 %v1340_v15, %v1166_v11 }
 0xe68   :  { %v4389_v32 = vadd.f32 %v4379_v63, %v1350_v28 }
 0xe69   :  { %v4382_v31 = vadd.f32 %v4379_v63, %v1349_v27 }
 0xe6b   :  { %2659 = vmatmul.mubr.msk.f32.vlgmr.msra.gmra.mrb[10].mxu0 %vm56_vm0, %v4382_v31 }
 0xe6c   :  { %3386 = vmatpush3.bf16.msra.mxu0 %v4038_v35  ;;  %1434 = vmatprep.mubr.f32.mxu0 %v3894_v0 }
 0xe6d   :  { %3388 = vmatprep.subr.bf16.mxu0 %v4043_v37 }
 0xe6f   :  { %2660 = vmatmul.mubr.msk.f32.gmra.mrb[12].mxu0 %vm56_vm0, %v4389_v32 }
 0xe70   :  { %3390 = vmatpush3.bf16.msra.mxu0 %v4043_v37  ;;  %3049 = vmatprep.mubr.msk.f32.mxu0 %vm56_vm0, %v4382_v31 }
 0xe71   :  { %3416 = vmatprep.subr.bf16.mxu0 %v4074_v53 }
 0xe73   :  { %3050 = vmatmul.mubr.msk.f32.vlgmr.msra.gmra.mrb[14].mxu0 %vm56_vm0, %v4389_v32 }
 0xe74   :  { %3418 = vmatpush3.bf16.msra.mxu0 %v4074_v53 }
 0xe75   :  { %3420 = vmatprep.subr.bf16.mxu0 %v4079_v55 }
 0xe78   :  { %3422 = vmatpush3.bf16.msra.mxu0 %v4079_v55 }
 0xe79   :  { %3424 = vmatprep.subr.bf16.mxu0 %v4105_v6 }
 0xe7c   :  { %3426 = vmatpush3.bf16.msra.mxu0 %v4105_v6 }
 0xe7d   :  { %3428 = vmatprep.subr.bf16.mxu0 %v4117_v13 }
 0xe80   :  { %3430 = vmatpush3.bf16.msra.mxu0 %v4117_v13 }
 0xf3e   :  { %v1430_v35 = vpop.f32.mrb[10].mxu0 }
 0xf3f   :  { %v1432_v37 = vpop.f32.mrb[11].mxu0  ;;  %3068 = vmatprep.mubr.msk.f32.mxu1 %vm56_vm0, %v1430_v35 }
 0xf42   :  { %v1436_v34 = vpop.f32.mrb[12].mxu0 }
 0xf43   :  { %v3676_v38 = vpack.i.bf16 %v1436_v34, %v1430_v35  ;;  %v1438_v4 = vpop.f32.mrb[13].mxu0 }
 0xf44   :  { %v3706_v42 = vpack.i.bf16 %v1438_v4, %v1432_v37 }
 0xf45   :  { %3677 = vrot.lane.b32.xlu0 %v3676_v38, %s3897_s13  ;;  %3672 = vrot.lane.b32.xlu1 %v3676_v38, %s3895_s0 }
 0xf46   :  { %v3051_v47 = vpop.f32.mrb[14].mxu0 }
 0xf47   :  { %v1507_v48 = vpop.f32.mrb[15].mxu0 }
 0xf48   :  { %v3711_v49 = vpack.i.bf16 %v3051_v47, %v1507_v48 }
 0xf49   :  { %3682 = vrot.lane.b32.xlu1 %v3706_v42, %s3896_s12 }
 0xfb7   :  { %v3678_v50 = vpop.permute.xlu0 %3677  ;;  %v3673_v51 = vpop.permute.xlu1 %3672 }
 0xfb8   :  { %v3675_v52 = vunpack.i.h.bf16 %v3673_v51  ;;  %v3674_v60 = vunpack.i.l.bf16 %v3673_v51  ;;  %3692 = vrot.lane.b32.xlu0 %v3678_v50, %s3895_s0  ;;  %3687 = vrot.lane.b32.xlu1 %v3673_v51, %s3895_s0 }
 0xfba   :  { %v3391_v1 = vpack.c.bf16 %v3675_v52, %v3674_v60 }
 0xfbb   :  { %v3683_v5 = vpop.permute.xlu1 %3682 }
 0xfbc   :  { %3393 = vmatprep.subr.msk.bf16.mxu1 %vm4018_vm1, %v3391_v1  ;;  %3697 = vrot.lane.b32.xlu1 %v3683_v5, %s3895_s0 }
 0xfbd   :  { %3396 = vmatpush3.bf16.xpose.msk.msra.mxu1 %vm4018_vm1, %v3391_v1 }
0x102a   :  { %v3693_v7 = vpop.permute.xlu0 %3692  ;;  %v3688_v10 = vpop.permute.xlu1 %3687 }
0x102b   :  { %v3695_v11 = vunpack.i.h.bf16 %v3693_v7  ;;  %v3694_v14 = vunpack.i.l.bf16 %v3693_v7  ;;  %v3690_v16 = vunpack.i.h.bf16 %v3688_v10  ;;  %v3689_v17 = vunpack.i.l.bf16 %v3688_v10 }
0x102d   :  { %v3397_v21 = vpack.c.bf16 %v3690_v16, %v3689_v17  ;;  %v3403_v9 = vpack.c.bf16 %v3695_v11, %v3694_v14 }
0x102e   :  { %v3698_v12 = vpop.permute.xlu1 %3697 }
0x102f   :  { %3399 = vmatprep.subr.msk.bf16.mxu1 %vm4018_vm1, %v3397_v21  ;;  %v3700_v20 = vunpack.i.h.bf16 %v3698_v12  ;;  %v3699_v22 = vunpack.i.l.bf16 %v3698_v12 }
0x1030   :  { %3402 = vmatpush3.bf16.xpose.msk.msra.mxu1 %vm4018_vm1, %v3397_v21 }
0x1031   :  { %3405 = vmatprep.subr.msk.bf16.mxu1 %vm4018_vm1, %v3403_v9  ;;  %v3409_v23 = vpack.c.bf16 %v3700_v20, %v3699_v22 }
0x1038   :  { %3408 = vmatpush3.bf16.xpose.msk.msra.mxu1 %vm4018_vm1, %v3403_v9 }
0x1039   :  { %3411 = vmatprep.subr.msk.bf16.mxu1 %vm4018_vm1, %v3409_v23 }
0x1040   :  { %3414 = vmatpush3.bf16.xpose.msk.msra.mxu1 %vm4018_vm1, %v3409_v23 }
0x1041   :  { %3448 = vmatprep.subr.bf16.mxu1 %v4162_v26 }
0x1047   :  { %3069 = vmatmul.mubr.msk.f32.vlgmr.msra.gmra.mrb[18].mxu1 %vm56_vm0, %v1436_v34 }
0x1048   :  { %3450 = vmatpush1.bf16.msra.mxu1 %v4170_v24  ;;  %1955 = vmatprep.mubr.f32.mxu1 %v3894_v0 }
0x1049   :  { %3452 = vmatprep.subr.bf16.mxu1 %v4183_v33 }
0x104c   :  { %3454 = vmatpush1.bf16.msra.mxu1 %v4196_v40 }
0x111a   :  { %v3070_v18 = vpop.f32.mrb[18].mxu1 }
0x111b   :  { %v1650_v3 = vadd.f32 %v3070_v18, %v4088_v56  ;;  %v1644_v15 = vpop.f32.mrb[19].mxu1 }
0x111c   :  { %v1645_v27 = vadd.f32 %v1644_v15, %v4093_v57 }
0x111d   :  { %v1656_v28 = vsel %vm354_vm2, %v1650_v3, -inf }
0x111e   :  { %1657 = vmax.xlane.f32.xlu1 %v1656_v28  ;;  %v1653_v26 = vsel %vm354_vm2, %v1645_v27, -inf }
0x111f   :  { %1654 = vmax.xlane.f32.xlu0 %v1653_v26 }
0x112f   :  { %3707 = vrot.lane.b32.xlu1 %v3706_v42, %s3897_s13 }
0x1135   :  { %3702 = vrot.lane.b32.xlu0 %v3706_v42, %s3895_s0 }
0x1139   :  { %3712 = vrot.lane.b32.xlu0 %v3711_v49, %s3896_s12 }
0x11ab   :  { %v1658_v24 = vpop.xlane.xlu1 %1657 }
0x11ac   :  { %v1660_v33 = vsub.f32 %v1650_v3, %v1658_v24  ;;  %v1655_v40 = vpop.xlane.xlu0 %1654 }
0x11ad   :  { %v1659_v35 = vsub.f32 %v1645_v27, %v1655_v40 }
0x11ae   :  { %v1663_v56 = vmul.f32 1.442695, %v1660_v33 }
0x11af   :  { %v1661_v37 = vmul.f32 1.442695, %v1659_v35  ;;  %v3708_v34 = vpop.permute.xlu1 %3707 }
0x11b0   :  { %v3703_v57 = vpop.permute.xlu0 %3702  ;;  %3722 = vrot.lane.b32.xlu0 %v3708_v34, %s3895_s0 }
0x11b1   :  { %3815 = vpow2.f32 %v1661_v37  ;;  %v3705_v38 = vunpack.i.h.bf16 %v3703_v57  ;;  %v3704_v4 = vunpack.i.l.bf16 %v3703_v57  ;;  %3717 = vrot.lane.b32.xlu1 %v3703_v57, %s3895_s0 }
0x11b2   :  { %3817 = vpow2.f32 %v1663_v56 }
0x11b3   :  { %v3431_v47 = vpack.c.bf16 %v3705_v38, %v3704_v4 }
0x11b4   :  { %v3713_v48 = vpop.permute.xlu0 %3712 }
0x11b5   :  { %3432 = vmatprep.subr.bf16.mxu0 %v3431_v47  ;;  %3727 = vrot.lane.b32.xlu1 %v3713_v48, %s3895_s0 }
0x11bb   :  { %v3816_v42 = vpop.eup %3815 }
0x11bc   :  { %v3818_v49 = vpop.eup %3817  ;;  %3087 = vmatprep.mubr.msk.f32.mxu0 %vm354_vm2, %v3816_v42 }
0x11bd   :  { %3088 = vmatmul.mubr.msk.f32.vlgmr.msra.gmra.mrb[16].mxu0 %vm354_vm2, %v3818_v49 }
0x11be   :  { %3434 = vmatpush3.bf16.msra.mxu0 %v3431_v47 }
0x1222   :  { %v3723_v50 = vpop.permute.xlu0 %3722 }
0x1223   :  { %v3718_v51 = vpop.permute.xlu1 %3717  ;;  %v3725_v52 = vunpack.i.h.bf16 %v3723_v50  ;;  %v3724_v60 = vunpack.i.l.bf16 %v3723_v50 }
0x1224   :  { %v3720_v1 = vunpack.i.h.bf16 %v3718_v51  ;;  %v3719_v5 = vunpack.i.l.bf16 %v3718_v51 }
0x1225   :  { %v3439_v11 = vpack.c.bf16 %v3725_v52, %v3724_v60 }
0x1226   :  { %v3435_v7 = vpack.c.bf16 %v3720_v1, %v3719_v5 }
0x1227   :  { %v3728_v10 = vpop.permute.xlu1 %3727 }
0x1228   :  { %v3730_v14 = vunpack.i.h.bf16 %v3728_v10  ;;  %v3729_v16 = vunpack.i.l.bf16 %v3728_v10  ;;  %3436 = vmatprep.subr.bf16.mxu0 %v3435_v7 }
0x1229   :  { %3438 = vmatpush3.bf16.msra.mxu0 %v3435_v7 }
0x122a   :  { %3440 = vmatprep.subr.bf16.mxu0 %v3439_v11  ;;  %v3443_v17 = vpack.c.bf16 %v3730_v14, %v3729_v16 }
0x122d   :  { %3442 = vmatpush3.bf16.msra.mxu0 %v3439_v11 }
0x122e   :  { %3444 = vmatprep.subr.bf16.mxu0 %v3443_v17 }
0x1231   :  { %3446 = vmatpush3.bf16.msra.mxu0 %v3443_v17 }
0x1232   :  { %3456 = vmatprep.subr.bf16.mxu0 %v4194_v39 }
0x1290   :  { %v3089_v21 = vpop.f32.mrb[16].mxu0 }
0x1291   :  { %v1743_v9 = vadd.f32 %v3089_v21, %v4132_v45  ;;  %v1737_v12 = vpop.f32.mrb[17].mxu0 }
0x1292   :  { %v1738_v20 = vadd.f32 %v1737_v12, %v4137_v46 }
0x1293   :  { %v1747_v22 = vmax.f32 %v1743_v9, 1e-30 }
0x1294   :  { %v1746_v23 = vmax.f32 %v1738_v20, 1e-30 }
0x1295   :  { %3819 = vrcp.f32 %v1747_v22 }
0x1296   :  { %3821 = vrcp.f32 %v1746_v23 }
0x129f   :  { %v3820_v18 = vpop.eup %3819 }
0x12a0   :  { %v3822_v3 = vpop.eup %3821  ;;  %v1751_v27 = vmul.f32 %v3820_v18, %v3818_v49 }
0x12a1   :  { %v1750_v15 = vmul.f32 %v3822_v3, %v3816_v42 }
0x12a3   :  { %3106 = vmatprep.mubr.msk.f32.mxu0 %vm354_vm2, %v1750_v15 }
0x12a4   :  { %3107 = vmatmul.mubr.msk.f32.vlgmr.msra.gmra.mrb[18].mxu0 %vm354_vm2, %v1751_v27 }
0x12a5   :  { %3458 = vmatpush3.bf16.msra.mxu0 %v4194_v39 }
0x12a6   :  { %3460 = vmatprep.subr.bf16.mxu0 %v4208_v43 }
0x12a9   :  { %3462 = vmatpush3.bf16.msra.mxu0 %v4208_v43 }
0x12aa   :  { %3488 = vmatprep.subr.bf16.mxu0 %v4074_v53 }
0x1377   :  { %v3108_v45 = vpop.f32.mrb[18].mxu0 }
0x1378   :  { %v1850_v46 = vadd.f32 %v3108_v45, %v4146_v61  ;;  %v1844_v28 = vpop.f32.mrb[19].mxu0 }
0x1379   :  { %v1845_v26 = vadd.f32 %v4146_v61, %v1844_v28 }
0x137a   :  { %v1854_v24 = vadd.f32 %v1850_v46, %v4389_v32 }
0x137b   :  { %v1853_v33 = vadd.f32 %v1845_v26, %v4382_v31 }
0x137c   :  { %v1858_v40 = vsel %vm56_vm0, %v1854_v24, 0.0 }
0x137d   :  { %1859 = vadd.xlane.f32.xlu1 %v1858_v40  ;;  %v1855_v39 = vsel %vm56_vm0, %v1853_v33, 0.0 }
0x137e   :  { %1856 = vadd.xlane.f32.xlu0 %v1855_v39 }
0x140a   :  { %v1860_v35 = vpop.xlane.xlu1 %1859 }
0x140b   :  { %v1862_v43 = vmul.f32 0.03125, %v1860_v35  ;;  %v1857_v56 = vpop.xlane.xlu0 %1856  ;;  %v3839_v35 = vld [vmem:[%s4591_s5 + $0x8] sm:$0xff] }
0x140c   :  { %v1861_v37 = vmul.f32 0.03125, %v1857_v56 }
0x140d   :  { %v1864_v34 = vsub.f32 %v1854_v24, %v1862_v43 }
0x140e   :  { %v1863_v57 = vsub.f32 %v1853_v33, %v1861_v37 }
0x140f   :  { %v1866_v61 = vmul.f32 %v1864_v34, %v1864_v34 }
0x1410   :  { %v1865_v38 = vmul.f32 %v1863_v57, %v1863_v57 }
0x1411   :  { %v1870_v32 = vsel %vm56_vm0, %v1866_v61, 0.0 }
0x1412   :  { %v1867_v4 = vsel %vm56_vm0, %v1865_v38, 0.0 }
0x1413   :  { %1868 = vadd.xlane.f32.xlu0 %v1867_v4 }
0x1417   :  { %1871 = vadd.xlane.f32.xlu0 %v1870_v32 }
0x14a0   :  { %v1869_v31 = vpop.xlane.xlu0 %1868 }
0x14a1   :  { %v1873_v47 = vmul.f32 0.03125, %v1869_v31 }
0x14a3   :  { %v1875_v48 = vadd.f32 1e-05, %v1873_v47 }
0x14a4   :  { %v1872_v42 = vpop.xlane.xlu0 %1871 }
0x14a5   :  { %3823 = vrsqrt.f32 %v1875_v48  ;;  %v1874_v49 = vmul.f32 0.03125, %v1872_v42 }
0x14a7   :  { %v1876_v50 = vadd.f32 1e-05, %v1874_v49 }
0x14a9   :  { %3825 = vrsqrt.f32 %v1876_v50 }
0x14af   :  { %v3824_v51 = vpop.eup %3823 }
0x14b0   :  { %v1879_v52 = vmul.f32 %v3824_v51, %v1863_v57 }
0x14b2   :  { %v1881_v60 = vmul.f32 %v4216_v54, %v1879_v52 }
0x14b3   :  { %v3826_v1 = vpop.eup %3825 }
0x14b4   :  { %v4467_v5 = vadd.f32 %v4221_v59, %v1881_v60  ;;  %v1880_v7 = vmul.f32 %v3826_v1, %v1864_v34 }
0x14b6   :  { %2677 = vmatmul.mubr.msk.f32.vlgmr.msra.gmra.mrb[20].mxu1 %vm56_vm0, %v4467_v5  ;;  %3117 = vmatprep.mubr.msk.f32.mxu0 %vm56_vm0, %v4467_v5  ;;  %v1882_v10 = vmul.f32 %v4216_v54, %v1880_v7 }
0x14b7   :  { %1961 = vmatprep.mubr.f32.mxu1 %v3894_v0 }
0x14b8   :  { %v4476_v11 = vadd.f32 %v4221_v59, %v1882_v10 }
0x14ba   :  { %2678 = vmatmul.mubr.msk.f32.gmra.mrb[22].mxu1 %vm56_vm0, %v4476_v11  ;;  %3118 = vmatmul.mubr.msk.f32.vlgmr.msra.gmra.mrb[20].mxu0 %vm56_vm0, %v4476_v11 }
0x14bb   :  { %3490 = vmatpush3.bf16.msra.mxu0 %v4074_v53 }
0x14bc   :  { %3492 = vmatprep.subr.bf16.mxu0 %v4079_v55 }
0x14bf   :  { %3494 = vmatpush3.bf16.msra.mxu0 %v4079_v55 }
0x14c0   :  { %3496 = vmatprep.subr.bf16.mxu0 %v4105_v6 }
0x14c3   :  { %3498 = vmatpush3.bf16.msra.mxu0 %v4105_v6 }
0x14c4   :  { %3500 = vmatprep.subr.bf16.mxu0 %v4117_v13 }
0x14c7   :  { %3502 = vmatpush3.bf16.msra.mxu0 %v4117_v13 }
0x1589   :  { %v1957_v0 = vpop.f32.mrb[20].mxu1 }
0x158a   :  { %v1959_v54 = vpop.f32.mrb[21].mxu1  ;;  %3136 = vmatprep.mubr.msk.f32.mxu1 %vm56_vm0, %v1957_v0 }
0x158d   :  { %v1963_v59 = vpop.f32.mrb[22].mxu1  ;;  %v3119_v14 = vpop.f32.mrb[20].mxu0 }
0x158e   :  { %v3736_v16 = vpack.i.bf16 %v1963_v59, %v1957_v0  ;;  %v1965_v53 = vpop.f32.mrb[23].mxu1  ;;  %v2034_v17 = vpop.f32.mrb[21].mxu0 }
0x158f   :  { %v3766_v21 = vpack.i.bf16 %v1965_v53, %v1959_v54  ;;  %v3771_v9 = vpack.i.bf16 %v3119_v14, %v2034_v17 }
0x1590   :  { %3737 = vrot.lane.b32.xlu0 %v3736_v16, %s3897_s13  ;;  %3732 = vrot.lane.b32.xlu1 %v3736_v16, %s3895_s0 }
0x1594   :  { %3742 = vrot.lane.b32.xlu1 %v3766_v21, %s3896_s12 }
0x1602   :  { %v3738_v55 = vpop.permute.xlu0 %3737  ;;  %v3733_v6 = vpop.permute.xlu1 %3732 }
0x1603   :  { %v3735_v13 = vunpack.i.h.bf16 %v3733_v6  ;;  %v3734_v12 = vunpack.i.l.bf16 %v3733_v6  ;;  %3752 = vrot.lane.b32.xlu0 %v3738_v55, %s3895_s0  ;;  %3747 = vrot.lane.b32.xlu1 %v3733_v6, %s3895_s0  ;;  %v3841_v55 = vld [vmem:[%s4591_s5 + $0x18] sm:$0xff] }
0x1605   :  { %v3463_v20 = vpack.c.bf16 %v3735_v13, %v3734_v12  ;;  %v3842_v12 = vld [vmem:[%s4591_s5 + $0x10] sm:$0xff]  ;;  %s3898_s5 = smov [#allocation5]  }
0x1606   :  { %v3743_v22 = vpop.permute.xlu1 %3742  ;;  %s2587_s3 = sshll.u32 %s3898_s5, 4  ;;  %s2588_s3 = int_to_ptr.vmem [resolvable:$true] %s2587_s3 }
0x1607   :  { %3465 = vmatprep.subr.msk.bf16.mxu1 %vm4018_vm1, %v3463_v20  ;;  %3757 = vrot.lane.b32.xlu1 %v3743_v22, %s3895_s0  ;;  %s3865_s17 = scalar_lea.vmem %s2588_s3, 256  ;;  %p3870_p9 = scmp.lt.s32.totalorder %s2588_s3, %s2588_s3 }
0x1608   :  { %3468 = vmatpush3.bf16.xpose.msk.msra.mxu1 %vm4018_vm1, %v3463_v20  ;;  %p3866_p8 = scmp.ne.s32.totalorder %s2588_s3, %s3865_s17  ;;  %p3871_p10 = scmp.lt.s32.totalorder %s3865_s17, %s3865_s17 }
0x160a   :  { %p3872_p11 = por %p3871_p10, %p3870_p9 }
0x160c   :  { %p3873_p12 = pnand %p3872_p11, %p3866_p8 }
0x1675   :  { %v3753_v23 = vpop.permute.xlu0 %3752  ;;  %v3748_v18 = vpop.permute.xlu1 %3747 }
0x1676   :  { %v3755_v3 = vunpack.i.h.bf16 %v3753_v23  ;;  %v3754_v15 = vunpack.i.l.bf16 %v3753_v23  ;;  %v3750_v27 = vunpack.i.h.bf16 %v3748_v18  ;;  %v3749_v45 = vunpack.i.l.bf16 %v3748_v18 }
0x1678   :  { %v3469_v46 = vpack.c.bf16 %v3750_v27, %v3749_v45  ;;  %v3475_v28 = vpack.c.bf16 %v3755_v3, %v3754_v15 }
0x1679   :  { %v3758_v26 = vpop.permute.xlu1 %3757 }
0x167a   :  { %3471 = vmatprep.subr.msk.bf16.mxu1 %vm4018_vm1, %v3469_v46  ;;  %v3760_v24 = vunpack.i.h.bf16 %v3758_v26  ;;  %v3759_v33 = vunpack.i.l.bf16 %v3758_v26 }
0x167b   :  { %3474 = vmatpush3.bf16.xpose.msk.msra.mxu1 %vm4018_vm1, %v3469_v46 }
0x167c   :  { %3477 = vmatprep.subr.msk.bf16.mxu1 %vm4018_vm1, %v3475_v28  ;;  %v3481_v40 = vpack.c.bf16 %v3760_v24, %v3759_v33 }
0x1683   :  { %3480 = vmatpush3.bf16.xpose.msk.msra.mxu1 %vm4018_vm1, %v3475_v28 }
0x1684   :  { %3483 = vmatprep.subr.msk.bf16.mxu1 %vm4018_vm1, %v3481_v40 }
0x168b   :  { %3486 = vmatpush3.bf16.xpose.msk.msra.mxu1 %vm4018_vm1, %v3481_v40 }
0x168c   :  { %3520 = vmatprep.subr.bf16.mxu1 %v4300_v25 }
0x1692   :  { %3137 = vmatmul.mubr.msk.f32.vlgmr.msra.gmra.mrb[24].mxu1 %vm56_vm0, %v1963_v59 }
0x1693   :  { %3522 = vmatpush3.bf16.msra.mxu1 %v4300_v25 }
0x1694   :  { %3524 = vmatprep.subr.bf16.mxu1 %v4304_v30 }
0x1697   :  { %3526 = vmatpush3.bf16.msra.mxu1 %v4304_v30 }
0x1765   :  { %v3138_v39 = vpop.f32.mrb[24].mxu1 }
0x1766   :  { %v2177_v43 = vadd.f32 %v3839_v35, %v3138_v39  ;;  %v2171_v56 = vpop.f32.mrb[25].mxu1 }
0x1767   :  { %v2172_v37 = vadd.f32 %v3840_v29, %v2171_v56 }
0x1768   :  { %v2183_v34 = vsel %vm354_vm2, %v2177_v43, -inf }
0x1769   :  { %2184 = vmax.xlane.f32.xlu1 %v2183_v34  ;;  %v2180_v25 = vsel %vm354_vm2, %v2172_v37, -inf }
0x176a   :  { %2181 = vmax.xlane.f32.xlu0 %v2180_v25 }
0x177a   :  { %3767 = vrot.lane.b32.xlu1 %v3766_v21, %s3897_s13 }
0x1780   :  { %3762 = vrot.lane.b32.xlu0 %v3766_v21, %s3895_s0 }
0x1784   :  { %3772 = vrot.lane.b32.xlu0 %v3771_v9, %s3896_s12 }
0x17f6   :  { %v2185_v30 = vpop.xlane.xlu1 %2184 }
0x17f7   :  { %v2187_v57 = vsub.f32 %v2177_v43, %v2185_v30  ;;  %v2182_v38 = vpop.xlane.xlu0 %2181 }
0x17f8   :  { %v2186_v4 = vsub.f32 %v2172_v37, %v2182_v38 }
0x17f9   :  { %v2190_v61 = vmul.f32 1.442695, %v2187_v57 }
0x17fa   :  { %v2188_v32 = vmul.f32 1.442695, %v2186_v4  ;;  %v3768_v31 = vpop.permute.xlu1 %3767 }
0x17fb   :  { %v3763_v47 = vpop.permute.xlu0 %3762  ;;  %3782 = vrot.lane.b32.xlu0 %v3768_v31, %s3895_s0 }
0x17fc   :  { %3827 = vpow2.f32 %v2188_v32  ;;  %v3765_v48 = vunpack.i.h.bf16 %v3763_v47  ;;  %v3764_v42 = vunpack.i.l.bf16 %v3763_v47  ;;  %3777 = vrot.lane.b32.xlu1 %v3763_v47, %s3895_s0 }
0x17fd   :  { %3829 = vpow2.f32 %v2190_v61 }
0x17fe   :  { %v3503_v49 = vpack.c.bf16 %v3765_v48, %v3764_v42 }
0x17ff   :  { %v3773_v50 = vpop.permute.xlu0 %3772 }
0x1800   :  { %3504 = vmatprep.subr.bf16.mxu0 %v3503_v49  ;;  %3787 = vrot.lane.b32.xlu1 %v3773_v50, %s3895_s0 }
0x1806   :  { %v3828_v51 = vpop.eup %3827 }
0x1807   :  { %v3830_v52 = vpop.eup %3829  ;;  %3155 = vmatprep.mubr.msk.f32.mxu0 %vm354_vm2, %v3828_v51 }
0x1808   :  { %3156 = vmatmul.mubr.msk.f32.vlgmr.msra.gmra.mrb[22].mxu0 %vm354_vm2, %v3830_v52 }
0x1809   :  { %3506 = vmatpush3.bf16.msra.mxu0 %v3503_v49 }
0x186d   :  { %v3783_v60 = vpop.permute.xlu0 %3782 }
0x186e   :  { %v3778_v1 = vpop.permute.xlu1 %3777  ;;  %v3785_v7 = vunpack.i.h.bf16 %v3783_v60  ;;  %v3784_v10 = vunpack.i.l.bf16 %v3783_v60 }
0x186f   :  { %v3780_v0 = vunpack.i.h.bf16 %v3778_v1  ;;  %v3779_v54 = vunpack.i.l.bf16 %v3778_v1 }
0x1870   :  { %v3511_v16 = vpack.c.bf16 %v3785_v7, %v3784_v10 }
0x1871   :  { %v3507_v59 = vpack.c.bf16 %v3780_v0, %v3779_v54 }
0x1872   :  { %v3788_v14 = vpop.permute.xlu1 %3787 }
0x1873   :  { %v3790_v53 = vunpack.i.h.bf16 %v3788_v14  ;;  %v3789_v17 = vunpack.i.l.bf16 %v3788_v14  ;;  %3508 = vmatprep.subr.bf16.mxu0 %v3507_v59 }
0x1874   :  { %3510 = vmatpush3.bf16.msra.mxu0 %v3507_v59 }
0x1875   :  { %3512 = vmatprep.subr.bf16.mxu0 %v3511_v16  ;;  %v3515_v21 = vpack.c.bf16 %v3790_v53, %v3789_v17 }
0x1878   :  { %3514 = vmatpush3.bf16.msra.mxu0 %v3511_v16 }
0x1879   :  { %3516 = vmatprep.subr.bf16.mxu0 %v3515_v21 }
0x187c   :  { %3518 = vmatpush3.bf16.msra.mxu0 %v3515_v21 }
0x187d   :  { %3528 = vmatprep.subr.bf16.mxu0 %v4318_v36 }
0x18db   :  { %v3157_v9 = vpop.f32.mrb[22].mxu0 }
0x18dc   :  { %v2270_v6 = vadd.f32 %v3841_v55, %v3157_v9  ;;  %v2264_v13 = vpop.f32.mrb[23].mxu0 }
0x18dd   :  { %v2265_v20 = vadd.f32 %v3842_v12, %v2264_v13 }
0x18de   :  { %v2274_v22 = vmax.f32 %v2270_v6, 1e-30 }
0x18df   :  { %v2273_v23 = vmax.f32 %v2265_v20, 1e-30 }
0x18e0   :  { %3831 = vrcp.f32 %v2274_v22 }
0x18e1   :  { %3833 = vrcp.f32 %v2273_v23 }
0x18ea   :  { %v3832_v18 = vpop.eup %3831 }
0x18eb   :  { %v3834_v3 = vpop.eup %3833  ;;  %v2278_v27 = vmul.f32 %v3832_v18, %v3830_v52 }
0x18ec   :  { %v2277_v15 = vmul.f32 %v3834_v3, %v3828_v51 }
0x18ee   :  { %3174 = vmatprep.mubr.msk.f32.mxu0 %vm354_vm2, %v2277_v15 }
0x18ef   :  { %3175 = vmatmul.mubr.msk.f32.vlgmr.msra.gmra.mrb[24].mxu0 %vm354_vm2, %v2278_v27 }
0x18f0   :  { %3530 = vmatpush3.bf16.msra.mxu0 %v4318_v36 }
0x18f1   :  { %3532 = vmatprep.subr.bf16.mxu0 %v4323_v41 }
0x18f4   :  { %3534 = vmatpush3.bf16.msra.mxu0 %v4323_v41 }
0x18f5   :  { %3536 = vmatprep.subr.bf16.mxu0 %v4334_v44 }
0x18f8   :  { %3538 = vmatpush3.bf16.msra.mxu0 %v4334_v44 }
0x18f9   :  { %3540 = vmatprep.subr.bf16.mxu0 %v4366_v19 }
0x18fc   :  { %3542 = vmatpush3.bf16.msra.mxu0 %v4366_v19 }
0x19c2   :  { %v3176_v45 = vpop.f32.mrb[24].mxu0 }
0x19c3   :  { %v2377_v46 = vadd.f32 %v3176_v45, %v4290_v58  ;;  %v2371_v28 = vpop.f32.mrb[25].mxu0 }
0x19c4   :  { %v2372_v26 = vadd.f32 %v4290_v58, %v2371_v28 }
0x19c5   :  { %v2381_v36 = vadd.f32 %v2377_v46, %v4476_v11 }
0x19c6   :  { %v2380_v24 = vadd.f32 %v2372_v26, %v4467_v5 }
0x19c7   :  { %v2385_v41 = vsel %vm56_vm0, %v2381_v36, 0.0 }
0x19c8   :  { %2386 = vadd.xlane.f32.xlu1 %v2385_v41  ;;  %v2382_v33 = vsel %vm56_vm0, %v2380_v24, 0.0 }
0x19c9   :  { %2383 = vadd.xlane.f32.xlu0 %v2382_v33 }
0x1a55   :  { %v2387_v44 = vpop.xlane.xlu1 %2386 }
0x1a56   :  { %v2389_v40 = vmul.f32 0.03125, %v2387_v44  ;;  %v2384_v39 = vpop.xlane.xlu0 %2383 }
0x1a57   :  { %v2388_v19 = vmul.f32 0.03125, %v2384_v39 }
0x1a58   :  { %v2391_v35 = vsub.f32 %v2381_v36, %v2389_v40 }
0x1a59   :  { %v2390_v43 = vsub.f32 %v2380_v24, %v2388_v19 }
0x1a5a   :  { %v2393_v58 = vmul.f32 %v2391_v35, %v2391_v35 }
0x1a5b   :  { %v2392_v56 = vmul.f32 %v2390_v43, %v2390_v43 }
0x1a5c   :  { %v2397_v11 = vsel %vm56_vm0, %v2393_v58, 0.0 }
0x1a5d   :  { %v2394_v29 = vsel %vm56_vm0, %v2392_v56, 0.0 }
0x1a5e   :  { %2395 = vadd.xlane.f32.xlu0 %v2394_v29 }
0x1a62   :  { %2398 = vadd.xlane.f32.xlu0 %v2397_v11 }
0x1aeb   :  { %v2396_v5 = vpop.xlane.xlu0 %2395 }
0x1aec   :  { %v2400_v37 = vmul.f32 0.03125, %v2396_v5 }
0x1aee   :  { %v2402_v34 = vadd.f32 1e-05, %v2400_v37 }
0x1aef   :  { %v2399_v25 = vpop.xlane.xlu0 %2398 }
0x1af0   :  { %3835 = vrsqrt.f32 %v2402_v34  ;;  %v2401_v30 = vmul.f32 0.03125, %v2399_v25 }
0x1af2   :  { %v2403_v57 = vadd.f32 1e-05, %v2401_v30 }
0x1af4   :  { %3837 = vrsqrt.f32 %v2403_v57 }
0x1afa   :  { %v3836_v38 = vpop.eup %3835 }
0x1afb   :  { %v2406_v4 = vmul.f32 %v3836_v38, %v2390_v43 }
0x1afd   :  { %v2408_v61 = vmul.f32 %v4342_v62, %v2406_v4 }
0x1afe   :  { %v3838_v32 = vpop.eup %3837 }
0x1aff   :  { %v2407_v31 = vmul.f32 %v3838_v32, %v2391_v35  ;;  %v2410_v47 = vadd.f32 %v4347_v2, %v2408_v61 }
0x1b01   :  { %v2409_v48 = vmul.f32 %v4342_v62, %v2407_v31  ;;  %3185 = vmatprep.mubr.msk.f32.mxu1 %vm56_vm0, %v2410_v47 }
0x1b03   :  { %v2411_v42 = vadd.f32 %v4347_v2, %v2409_v48 }
0x1b05   :  { %3186 = vmatmul.mubr.msk.f32.vlgmr.msra.gmra.mrb[26].mxu1 %vm56_vm0, %v2411_v42 }
0x1bd8   :  { %v3187_v49 = vpop.f32.mrb[26].mxu1 }
0x1bd9   :  { %v2490_v50 = vadd.f32 %v3187_v49, %v4370_v8  ;;  %v2484_v51 = vpop.f32.mrb[27].mxu1 }
0x1bda   :  { %v2485_v52 = vadd.f32 %v4370_v8, %v2484_v51 }
0x1bdb   :  { %v2494_v1 = vmax.f32 %v2490_v50, 0.0 }
0x1bdc   :  { %v2493_v60 = vmax.f32 %v2485_v52, 0.0 }
0x1bde   :  { %3204 = vmatprep.mubr.msk.f32.mxu0 %vm354_vm2, %v2493_v60 }
0x1bdf   :  { %3205 = vmatmul.mubr.msk.f32.vlgmr.msra.gmra.mrb[26].mxu0 %vm354_vm2, %v2494_v1 }
0x1cb2   :  { %v3206_v7 = vpop.f32.mrb[26].mxu0 }
0x1cb3   :  { %v2577_v62 = vadd.f32 %v3206_v7, %v2411_v42  ;;  %v2567_v10 = vpop.f32.mrb[27].mxu0 }
0x1cb4   :  { %v2576_v2 = vadd.f32 %v2567_v10, %v2410_v47 }
0x1cb5   :  { %v2579_v0 = vadd.f32 %v4379_v63, %v2577_v62 }
0x1cb6   :  { %v2578_v54 = vadd.f32 %v4379_v63, %v2576_v2 }
0x1cb7   :  { %2581 = vst.msk [vmem:[#allocation5 + $0x8] sm:$0xff] %vm56_vm0, %v2579_v0 }
0x1cb8   :  { %2580 = vst.msk [vmem:[#allocation5] sm:$0xff] %vm56_vm0, %v2578_v54 }
0x1cb9   :  { %3876 = shalt.err (!%p3873_p12)
}
0x1cba   :  { %s3877_s20 = scalar_lea.hbm %s4592_s6, 256 }
0x1cbb   :  { %p3878_p13 = scmp.ne.s32.totalorder %s4592_s6, %s3877_s20  ;;  %p3881_p0 = scmp.lt.u32.totalorder %s3877_s20, %s4592_s6 }
0x1cbd   :  { %p3883_p1 = pnand %p3881_p0, %p3878_p13 }
0x1cbf   :  { %3886 = shalt.err (!%p3883_p1)
}
0x1cc0   :  { %2593 = dma.vmem_to_hbm [thread:$0]  %s2588_s3, 256, %s4592_s6, [#allocation4], %s3892_s7, %s3892_s7, %s3893_s8  }
0x1cc1   :  { %3889 = dma.done.wait [#allocation4], 256  }
0x1cc2   :  { %3890 = vsyncadd [#allocation4], 4294967040 }
0x1cc3   :  { %2597 = vsyncpa [#allocation3], 1 }
0x1cc4   :  { %2598 = vsyncpa [#allocation4], 1 }

</bundles_post_ra>
